<compile_context>
chip_gen: v6e
topology: v6e:2x2x1
jax: 0.10.0
libtpu: 0.0.40
codegen_flags: <defaults>
</compile_context>

<pallas_src>
import functools
import math

import jax
import jax.numpy as jnp
from jax.experimental import pallas as pl
from jax.experimental.pallas import tpu as pltpu
from jax.scipy.special import erf as _jax_erf  # reference (outside kernels) only

_LN_EPS = 1e-12                        # BertLayerNorm eps


def _round_up(x, m):
    return ((x + m - 1) // m) * m


@functools.lru_cache(maxsize=None)
def _vmem_limit_bytes():
    """Per-generation VMEM budget: ~3/4 of physical capacity, capped at 96 MiB.
    v5e/v6e (128 MiB physical) -> 96 MiB; v7x (64 MiB) -> 48 MiB; fallback 48 MiB."""
    cap = None
    try:
        cap = getattr(pltpu.get_tpu_info(), "vmem_capacity_bytes", None)
    except Exception:
        cap = None
    if not cap:
        cap = 64 * 1024 * 1024
    return int(min(96 * 1024 * 1024, (cap * 3) // 4))


def _weight_spec(k, n):
    # Grid-invariant [K,N] weight: constant index_map + single buffer (no point
    # double-buffering a block that never changes -> saves K*N*itemsize of VMEM).
    return pl.BlockSpec((k, n), lambda i: (0, 0), pipeline_mode=pl.Buffered(1))


def _vec_spec(n):
    # Grid-invariant [1,N] bias / LN vectors, single-buffered.
    return pl.BlockSpec((1, n), lambda i: (0, 0), pipeline_mode=pl.Buffered(1))


# ---------------------------------------------------------------------------
# In-kernel math helpers
# ---------------------------------------------------------------------------
def _erf_in_kernel(x, fast):
    # Abramowitz & Stegun 7.1.26 rational approximation (max abs err ~1.5e-7).
    # Only mul/add/exp/select/reciprocal -> lowers natively in Mosaic.
    a1, a2, a3, a4, a5 = (0.254829592, -0.284496736, 1.421413741,
                          -1.453152027, 1.061405429)
    p = 0.3275911
    ax = jnp.abs(x)
    # fast=True sends the divide to the EUP (approx vrcp); exact otherwise.
    t = pl.reciprocal(1.0 + p * ax, approx=fast)
    poly = ((((a5 * t + a4) * t + a3) * t + a2) * t + a1) * t
    y = 1.0 - poly * jnp.exp(-ax * ax)
    return jnp.where(x >= 0.0, y, -y)


def _gelu_in_kernel(x, fast):
    # BERT gelu: x * 0.5 * (1 + erf(x / sqrt(2)))
    return x * 0.5 * (1.0 + _erf_in_kernel(x * 0.7071067811865476, fast))


# ---------------------------------------------------------------------------
# Kernels
# ---------------------------------------------------------------------------
def _linear_kernel(x_ref, w_ref, b_ref, o_ref, *, activation, fast):
    # x:(tm,K)  w:(K,N) resident  b:(1,N)  o:(tm,N); f32 MXU accumulation.
    acc = jnp.dot(x_ref[...], w_ref[...], preferred_element_type=jnp.float32)
    acc = acc + b_ref[...].astype(jnp.float32)
    if activation == "gelu":
        acc = _gelu_in_kernel(acc, fast)
    o_ref[...] = acc.astype(o_ref.dtype)


def _qkv_kernel(x_ref, w_ref, b_ref, q_ref, k_ref, v_ref, *, hidden):
    # One fused (tm,H) @ (H,3H) matmul, split into three lane-dense (tm,H)
    # outputs in-kernel (static lane slices) -> no XLA slicing/transposing.
    acc = jnp.dot(x_ref[...], w_ref[...], preferred_element_type=jnp.float32)
    acc = acc + b_ref[...].astype(jnp.float32)
    q_ref[...] = acc[:, :hidden].astype(q_ref.dtype)
    k_ref[...] = acc[:, hidden:2 * hidden].astype(k_ref.dtype)
    v_ref[...] = acc[:, 2 * hidden:].astype(v_ref.dtype)


def _linear_residual_ln_kernel(x_ref, res_ref, w_ref, b_ref, g_ref, bb_ref,
                               o_ref, *, eps):
    # dense -> +bias -> +residual -> LayerNorm(gamma, beta), all in f32.
    acc = jnp.dot(x_ref[...], w_ref[...], preferred_element_type=jnp.float32)
    acc = acc + b_ref[...].astype(jnp.float32) + res_ref[...].astype(jnp.float32)
    mean = jnp.mean(acc, axis=-1, keepdims=True)
    cent = acc - mean
    var = jnp.mean(cent * cent, axis=-1, keepdims=True)
    norm = cent * jax.lax.rsqrt(var + eps)
    o_ref[...] = (norm * g_ref[...].astype(jnp.float32)
                  + bb_ref[...].astype(jnp.float32)).astype(o_ref.dtype)


def _attention_kernel(q_ref, k_ref, v_ref, mask_ref, o_ref, *, scale, heads,
                      head_dim, fast):
    # Blocks: q/k/v/o (1, S, heads*head_dim), mask (1, 1, S).
    # One (batch, head-group) per grid step; heads processed with bounded
    # live ranges; MXU operands stay in the activation dtype (bf16-friendly),
    # softmax statistics in f32, normalization AFTER the P.V matmul.
    mask = mask_ref[0].astype(jnp.float32)                 # (1, S)
    q = q_ref[0]                                           # (S, hb*d)
    k = k_ref[0]
    v = v_ref[0]
    outs = []
    for h in range(heads):
        sl = slice(h * head_dim, (h + 1) * head_dim)
        qh = q[:, sl] * scale                              # scale on (S,d), not (S,S)
        kh = k[:, sl]
        vh = v[:, sl]
        s = jax.lax.dot_general(qh, kh, (((1,), (1,)), ((), ())),
                                preferred_element_type=jnp.float32)  # (S, S)
        s = s + mask
        m = jnp.max(s, axis=-1, keepdims=True)
        p = jnp.exp(s - m)
        l = jnp.sum(p, axis=-1, keepdims=True)             # (S, 1)
        ctx = jnp.dot(p.astype(vh.dtype), vh,
                      preferred_element_type=jnp.float32)  # (S, d)
        ctx = ctx * pl.reciprocal(l, approx=fast)          # post-PV normalize
        outs.append(ctx.astype(o_ref.dtype))
    # Lane-dense head-merged context block -> no XLA transpose afterwards.
    o_ref[...] = jnp.concatenate(outs, axis=-1)[None]


# ---------------------------------------------------------------------------
# pallas_call wrappers
# ---------------------------------------------------------------------------
def _linear(x2d, w_t, b, *, activation="none", tm_target=512, fast=False):
    M, K = x2d.shape
    N = w_t.shape[1]
    tm = min(tm_target, _round_up(M, 8))
    itemsize = x2d.dtype.itemsize
    cost = pl.CostEstimate(
        flops=int(2 * M * K * N),
        transcendentals=int(M * N if activation == "gelu" else 0),
        bytes_accessed=int((M * K + K * N + N + M * N) * itemsize))
    return pl.pallas_call(
        functools.partial(_linear_kernel, activation=activation, fast=fast),
        out_shape=jax.ShapeDtypeStruct((M, N), x2d.dtype),
        grid_spec=pltpu.PrefetchScalarGridSpec(
            num_scalar_prefetch=0,
            grid=(pl.cdiv(M, tm),),
            in_specs=[
                pl.BlockSpec((tm, K), lambda i: (i, 0)),   # activation rows
                _weight_spec(K, N),                        # resident weight (1 buf)
                _vec_spec(N),                              # bias (1 buf)
            ],
            out_specs=pl.BlockSpec((tm, N), lambda i: (i, 0)),
        ),
        compiler_params=pltpu.CompilerParams(
            dimension_semantics=("parallel",),
            vmem_limit_bytes=_vmem_limit_bytes()),
        cost_estimate=cost,
    )(x2d, w_t, b.reshape(1, N))


def _qkv_linear(x2d, w_t, b, hidden, *, tm_target=512):
    M, K = x2d.shape
    N = w_t.shape[1]          # 3 * hidden
    tm = min(tm_target, _round_up(M, 8))
    itemsize = x2d.dtype.itemsize
    cost = pl.CostEstimate(
        flops=int(2 * M * K * N), transcendentals=0,
        bytes_accessed=int((M * K + K * N + N + M * N) * itemsize))
    out_shape = tuple(jax.ShapeDtypeStruct((M, hidden), x2d.dtype)
                      for _ in range(3))
    out_specs = [pl.BlockSpec((tm, hidden), lambda i: (i, 0)) for _ in range(3)]
    return pl.pallas_call(
        functools.partial(_qkv_kernel, hidden=hidden),
        out_shape=out_shape,
        grid_spec=pltpu.PrefetchScalarGridSpec(
            num_scalar_prefetch=0,
            grid=(pl.cdiv(M, tm),),
            in_specs=[
                pl.BlockSpec((tm, K), lambda i: (i, 0)),
                _weight_spec(K, N),
                _vec_spec(N),
            ],
            out_specs=out_specs,
        ),
        compiler_params=pltpu.CompilerParams(
            dimension_semantics=("parallel",),
            vmem_limit_bytes=_vmem_limit_bytes()),
        cost_estimate=cost,
    )(x2d, w_t, b.reshape(1, N))


def _linear_residual_layernorm(x2d, res2d, w_t, b, gamma, beta, *,
                               eps=_LN_EPS, tm_target=512):
    M, K = x2d.shape
    N = w_t.shape[1]
    tm = min(tm_target, _round_up(M, 8))
    itemsize = x2d.dtype.itemsize
    cost = pl.CostEstimate(
        flops=int(2 * M * K * N + 10 * M * N),
        transcendentals=int(M),
        bytes_accessed=int((M * K + 2 * M * N + K * N + 3 * N) * itemsize))
    return pl.pallas_call(
        functools.partial(_linear_residual_ln_kernel, eps=eps),
        out_shape=jax.ShapeDtypeStruct((M, N), x2d.dtype),
        grid_spec=pltpu.PrefetchScalarGridSpec(
            num_scalar_prefetch=0,
            grid=(pl.cdiv(M, tm),),
            in_specs=[
                pl.BlockSpec((tm, K), lambda i: (i, 0)),   # dense input rows
                pl.BlockSpec((tm, N), lambda i: (i, 0)),   # residual rows
                _weight_spec(K, N),                        # resident weight (1 buf)
                _vec_spec(N),                              # bias
                _vec_spec(N),                              # LN gamma
                _vec_spec(N),                              # LN beta
            ],
            out_specs=pl.BlockSpec((tm, N), lambda i: (i, 0)),
        ),
        compiler_params=pltpu.CompilerParams(
            dimension_semantics=("parallel",),
            vmem_limit_bytes=_vmem_limit_bytes()),
        cost_estimate=cost,
    )(x2d, res2d, w_t, b.reshape(1, N), gamma.reshape(1, N), beta.reshape(1, N))


def _heads_per_group(num_heads, head_dim):
    """Heads per attention grid step so the q/k/v/out feature slice is lane-legal:
    multiple of 128 lanes when possible, else all heads (block == full H)."""
    if head_dim % 128 == 0:
        return 1
    if 128 % head_dim == 0:
        hb = 128 // head_dim
        if num_heads % hb == 0:
            return hb
    return num_heads


def _attention(q, k, v, mask, *, num_heads, scale, fast=False):
    B, S, H = q.shape
    d = H // num_heads
    hb = _heads_per_group(num_heads, d)
    groups = num_heads // hb
    gh = hb * d
    itemsize = q.dtype.itemsize
    cost = pl.CostEstimate(
        flops=int(4 * B * num_heads * S * S * d),
        transcendentals=int(B * num_heads * S * S),
        bytes_accessed=int(4 * B * S * H * itemsize + B * S * mask.dtype.itemsize))
    qkv_spec = pl.BlockSpec((1, S, gh), lambda b, g: (b, 0, g))
    return pl.pallas_call(
        functools.partial(_attention_kernel, scale=scale, heads=hb,
                          head_dim=d, fast=fast),
        out_shape=jax.ShapeDtypeStruct((B, S, H), q.dtype),
        grid_spec=pltpu.PrefetchScalarGridSpec(
            num_scalar_prefetch=0,
            grid=(B, groups),                       # more parallel steps (v7x megacore)
            in_specs=[qkv_spec, qkv_spec, qkv_spec,
                      pl.BlockSpec((1, 1, S), lambda b, g: (b, 0, 0))],
            out_specs=pl.BlockSpec((1, S, gh), lambda b, g: (b, 0, g)),
        ),
        compiler_params=pltpu.CompilerParams(
            dimension_semantics=("parallel", "parallel"),
            vmem_limit_bytes=_vmem_limit_bytes()),
        cost_estimate=cost,
    )(q, k, v, mask)


# ---------------------------------------------------------------------------
# Parameter prep (one-time, outside the hot path) and forward pass
# ---------------------------------------------------------------------------
def prepare_params(raw, dtype=None):
    """Pre-transpose dense weights to [in, out] and fuse Q/K/V into one
    [H, 3H] weight.  dtype=jnp.bfloat16 recommended for production
    (bf16-native MXU on v5e/v6e/v7x); elementwise math stays f32 in-kernel."""
    cast = (lambda a: a.astype(dtype)) if dtype is not None else (lambda a: a)
    wqkv_t = jnp.concatenate([raw["wq"].T, raw["wk"].T, raw["wv"].T], axis=1)
    bqkv = jnp.concatenate([raw["bq"], raw["bk"], raw["bv"]])
    return {
        "wqkv_t": cast(wqkv_t), "bqkv": cast(bqkv),
        "wo_t": cast(raw["wo"].T), "bo": cast(raw["bo"]),
        "ln1_g": cast(raw["ln1_g"]), "ln1_b": cast(raw["ln1_b"]),
        "wi_t": cast(raw["wi"].T), "bi": cast(raw["bi"]),
        "wout_t": cast(raw["wout"].T), "bout": cast(raw["bout"]),
        "ln2_g": cast(raw["ln2_g"]), "ln2_b": cast(raw["ln2_b"]),
    }


def bert_layer_forward(params, hidden_states, attention_mask, *, num_heads,
                       tm_target=512, fast_math=False):
    """BertLayer.forward (dropout = identity, i.e. eval mode).
    fast_math=True routes GELU/softmax reciprocals to the approx EUP path
    (recommended with bf16 params); keep False for strict f32 checks."""
    B, S, H = hidden_states.shape
    d = H // num_heads
    M = B * S
    dtype = params["wqkv_t"].dtype
    x2 = hidden_states.reshape(M, H).astype(dtype)

    # Fused Q/K/V projection: one [M, H] @ [H, 3H] matmul, split in-kernel into
    # three lane-dense (M, H) buffers (no XLA transposes or slices).
    q, k, v = _qkv_linear(x2, params["wqkv_t"], params["bqkv"], H,
                          tm_target=tm_target)
    q = q.reshape(B, S, H)
    k = k.reshape(B, S, H)
    v = v.reshape(B, S, H)
    mask = attention_mask.reshape(B, 1, S).astype(jnp.float32)

    # Attention: context comes back lane-dense as (B, S, H) -> free reshape.
    ctx = _attention(q, k, v, mask, num_heads=num_heads,
                     scale=1.0 / math.sqrt(d), fast=fast_math)
    ctx2 = ctx.reshape(M, H)

    # BertSelfOutput: dense + residual + LayerNorm.
    attn_out = _linear_residual_layernorm(ctx2, x2, params["wo_t"], params["bo"],
                                          params["ln1_g"], params["ln1_b"],
                                          tm_target=tm_target)
    # BertIntermediate: dense + exact-erf GELU (fused in-kernel).
    inter = _linear(attn_out, params["wi_t"], params["bi"], activation="gelu",
                    tm_target=tm_target, fast=fast_math)
    # BertOutput: dense + residual + LayerNorm.
    out = _linear_residual_layernorm(inter, attn_out, params["wout_t"],
                                     params["bout"], params["ln2_g"],
                                     params["ln2_b"], tm_target=tm_target)
    return out.reshape(B, S, H)


# ---------------------------------------------------------------------------
# Pure-JAX reference (mirrors the PyTorch module exactly)
# ---------------------------------------------------------------------------
def bert_layer_reference(raw, hidden, attention_mask, *, num_heads):
    B, S, H = hidden.shape
    d = H // num_heads

    def linear(x, w, b):
        return x @ w.T + b

    def split_heads(x):
        return x.reshape(B, S, num_heads, d).transpose(0, 2, 1, 3)

    q = split_heads(linear(hidden, raw["wq"], raw["bq"]))
    k = split_heads(linear(hidden, raw["wk"], raw["bk"]))
    v = split_heads(linear(hidden, raw["wv"], raw["bv"]))
    scores = jnp.einsum("bhqd,bhkd->bhqk", q, k) / math.sqrt(d) + attention_mask
    probs = jax.nn.softmax(scores, axis=-1)
    ctx = jnp.einsum("bhqk,bhkd->bhqd", probs, v)
    ctx = ctx.transpose(0, 2, 1, 3).reshape(B, S, H)

    def layer_norm(x, g, b):
        u = x.mean(-1, keepdims=True)
        s = ((x - u) ** 2).mean(-1, keepdims=True)
        return (x - u) / jnp.sqrt(s + _LN_EPS) * g + b

    attn_out = layer_norm(linear(ctx, raw["wo"], raw["bo"]) + hidden,
                          raw["ln1_g"], raw["ln1_b"])
    inter = linear(attn_out, raw["wi"], raw["bi"])
    inter = inter * 0.5 * (1.0 + _jax_erf(inter / math.sqrt(2.0)))   # exact gelu
    out = layer_norm(linear(inter, raw["wout"], raw["bout"]) + attn_out,
                     raw["ln2_g"], raw["ln2_b"])
    return out


# ---------------------------------------------------------------------------
if __name__ == "__main__":
    B, S, H, NH = 2, 8, 32, 4
    I = 4 * H

    key = jax.random.PRNGKey(0)
    keys = jax.random.split(key, 20)

    def lin_init(kw, kb, out_f, in_f):
        bound = 1.0 / math.sqrt(in_f)
        w = jax.random.uniform(kw, (out_f, in_f), minval=-bound, maxval=bound,
                               dtype=jnp.float32)
        b = jax.random.uniform(kb, (out_f,), minval=-bound, maxval=bound,
                               dtype=jnp.float32)
        return w, b

    raw = {}
    raw["wq"], raw["bq"] = lin_init(keys[0], keys[1], H, H)
    raw["wk"], raw["bk"] = lin_init(keys[2], keys[3], H, H)
    raw["wv"], raw["bv"] = lin_init(keys[4], keys[5], H, H)
    raw["wo"], raw["bo"] = lin_init(keys[6], keys[7], H, H)
    raw["wi"], raw["bi"] = lin_init(keys[8], keys[9], I, H)
    raw["wout"], raw["bout"] = lin_init(keys[10], keys[11], H, I)
    raw["ln1_g"] = 1.0 + 0.1 * jax.random.normal(keys[12], (H,), jnp.float32)
    raw["ln1_b"] = 0.1 * jax.random.normal(keys[13], (H,), jnp.float32)
    raw["ln2_g"] = 1.0 + 0.1 * jax.random.normal(keys[14], (H,), jnp.float32)
    raw["ln2_b"] = 0.1 * jax.random.normal(keys[15], (H,), jnp.float32)

    hidden = jax.random.normal(keys[16], (B, S, H), dtype=jnp.float32)

    # Additive attention mask [B, 1, 1, S]: batch 0 fully visible, batch 1 has
    # its last two key positions masked (-10000), like BERT's extended mask.
    key_lengths = jnp.array([S, S - 2], dtype=jnp.int32)
    valid = (jnp.arange(S)[None, :] < key_lengths[:, None]).astype(jnp.float32)
    attention_mask = (1.0 - valid)[:, None, None, :] * -10000.0

    # Parameter prep (transposes / QKV fusion) once, outside the hot path.
    # Production: prepare_params(raw, dtype=jnp.bfloat16) and fast_math=True.
    params = prepare_params(raw)

    fwd = jax.jit(functools.partial(bert_layer_forward, num_heads=NH))
    out = fwd(params, hidden, attention_mask)
    out = jax.block_until_ready(out)

    ref = bert_layer_reference(raw, hidden, attention_mask, num_heads=NH)
    assert out.shape == (B, S, H)
    assert jnp.allclose(out, ref, atol=2e-4, rtol=2e-4), \
        float(jnp.max(jnp.abs(out - ref)))

    print("KERNEL_OK")
</pallas_src>

<mosaic_0001>
module attributes {stable_mosaic.version = 11 : i64} {
  func.func @_linear_kernel(%arg0: i32, %arg1: memref<16x32xf32, #tpu.memory_space<vmem>>, %arg2: memref<32x128xf32, #tpu.memory_space<vmem>>, %arg3: memref<1x128xf32, #tpu.memory_space<vmem>>, %arg4: memref<16x128xf32, #tpu.memory_space<vmem>>) attributes {dimension_semantics = [#tpu.dimension_semantics<parallel>], iteration_bounds = array<i64: 1>, scalar_prefetch = 0 : i64, scratch_operands = 0 : i64, tpu.core_type = #tpu.core_type<tc>, window_params = [{transform_indices = @transform_0, window_bounds = array<i64: 16, 32>}, {pipeline_mode = #tpu.pipeline_mode<synchronous>, transform_indices = @transform_1, window_bounds = array<i64: 32, 128>}, {pipeline_mode = #tpu.pipeline_mode<synchronous>, transform_indices = @transform_2, window_bounds = array<i64: 1, 128>}, {transform_indices = @transform_3, window_bounds = array<i64: 16, 128>}]} {
    %c0 = arith.constant 0 : index
    %c0_0 = arith.constant 0 : index
    %0 = vector.load %arg1[%c0, %c0_0] : memref<16x32xf32, #tpu.memory_space<vmem>>, vector<16x32xf32>
    %c0_1 = arith.constant 0 : index
    %c0_2 = arith.constant 0 : index
    %1 = vector.load %arg2[%c0_1, %c0_2] : memref<32x128xf32, #tpu.memory_space<vmem>>, vector<32x128xf32>
    %cst = arith.constant dense<0.000000e+00> : vector<16x128xf32>
    %2 = tpu.matmul %0, %1, %cst {dimension_numbers = #tpu.dot_dimension_numbers<[1], [0], [0], [1], [0, 0, 1, 1], [], []>} : vector<16x32xf32>, vector<32x128xf32>, vector<16x128xf32> -> vector<16x128xf32>
    %c0_3 = arith.constant 0 : index
    %c0_4 = arith.constant 0 : index
    %3 = vector.load %arg3[%c0_3, %c0_4] : memref<1x128xf32, #tpu.memory_space<vmem>>, vector<1x128xf32>
    %4 = vector.broadcast %3 : vector<1x128xf32> to vector<16x128xf32>
    %5 = arith.addf %2, %4 : vector<16x128xf32>
    %cst_5 = arith.constant 5.000000e-01 : f32
    %6 = vector.broadcast %cst_5 : f32 to vector<16x128xf32>
    %7 = arith.mulf %5, %6 : vector<16x128xf32>
    %cst_6 = arith.constant 0.707106769 : f32
    %8 = vector.broadcast %cst_6 : f32 to vector<16x128xf32>
    %9 = arith.mulf %5, %8 : vector<16x128xf32>
    %10 = math.absf %9 : vector<16x128xf32>
    %cst_7 = arith.constant 0.327591091 : f32
    %11 = vector.broadcast %cst_7 : f32 to vector<16x128xf32>
    %12 = arith.mulf %11, %10 : vector<16x128xf32>
    %cst_8 = arith.constant 1.000000e+00 : f32
    %13 = vector.broadcast %cst_8 : f32 to vector<16x128xf32>
    %14 = arith.addf %13, %12 : vector<16x128xf32>
    %15 = tpu.reciprocal %14 : vector<16x128xf32> -> vector<16x128xf32>
    %cst_9 = arith.constant 1.06140542 : f32
    %16 = vector.broadcast %cst_9 : f32 to vector<16x128xf32>
    %17 = arith.mulf %16, %15 : vector<16x128xf32>
    %cst_10 = arith.constant -1.45315206 : f32
    %18 = vector.broadcast %cst_10 : f32 to vector<16x128xf32>
    %19 = arith.addf %17, %18 : vector<16x128xf32>
    %20 = arith.mulf %19, %15 : vector<16x128xf32>
    %cst_11 = arith.constant 1.42141378 : f32
    %21 = vector.broadcast %cst_11 : f32 to vector<16x128xf32>
    %22 = arith.addf %20, %21 : vector<16x128xf32>
    %23 = arith.mulf %22, %15 : vector<16x128xf32>
    %cst_12 = arith.constant -0.284496725 : f32
    %24 = vector.broadcast %cst_12 : f32 to vector<16x128xf32>
    %25 = arith.addf %23, %24 : vector<16x128xf32>
    %26 = arith.mulf %25, %15 : vector<16x128xf32>
    %cst_13 = arith.constant 0.254829586 : f32
    %27 = vector.broadcast %cst_13 : f32 to vector<16x128xf32>
    %28 = arith.addf %26, %27 : vector<16x128xf32>
    %29 = arith.mulf %28, %15 : vector<16x128xf32>
    %cst_14 = arith.constant 0.000000e+00 : f32
    %30 = vector.broadcast %cst_14 : f32 to vector<16x128xf32>
    %31 = arith.subf %30, %10 : vector<16x128xf32>
    %32 = arith.mulf %31, %10 : vector<16x128xf32>
    %33 = math.exp %32 : vector<16x128xf32>
    %34 = arith.mulf %29, %33 : vector<16x128xf32>
    %cst_15 = arith.constant 1.000000e+00 : f32
    %35 = vector.broadcast %cst_15 : f32 to vector<16x128xf32>
    %36 = arith.subf %35, %34 : vector<16x128xf32>
    %cst_16 = arith.constant 0.000000e+00 : f32
    %37 = vector.broadcast %cst_16 : f32 to vector<16x128xf32>
    %38 = arith.cmpf oge, %9, %37 : vector<16x128xf32>
    %cst_17 = arith.constant 0.000000e+00 : f32
    %39 = vector.broadcast %cst_17 : f32 to vector<16x128xf32>
    %40 = arith.subf %39, %36 : vector<16x128xf32>
    %41 = arith.select %38, %36, %40 : vector<16x128xi1>, vector<16x128xf32>
    %cst_18 = arith.constant 1.000000e+00 : f32
    %42 = vector.broadcast %cst_18 : f32 to vector<16x128xf32>
    %43 = arith.addf %42, %41 : vector<16x128xf32>
    %44 = arith.mulf %7, %43 : vector<16x128xf32>
    %c0_19 = arith.constant 0 : index
    %c0_20 = arith.constant 0 : index
    %45 = vector.load %arg4[%c0_19, %c0_20] : memref<16x128xf32, #tpu.memory_space<vmem>>, vector<16x128xf32>
    tpu.vector_store %arg4[%c0_19, %c0_20], %44 {strides = array<i32>} : memref<16x128xf32, #tpu.memory_space<vmem>>, vector<16x128xf32>,
    return
  }
  func.func @transform_0(%arg0: i32) -> (i32, i32) {
    %c0_i32 = arith.constant 0 : i32
    %c0_i32_0 = arith.constant 0 : i32
    return %arg0, %c0_i32 : i32, i32
  }
  func.func @transform_1(%arg0: i32) -> (i32, i32) {
    %c0_i32 = arith.constant 0 : i32
    %c0_i32_0 = arith.constant 0 : i32
    %c0_i32_1 = arith.constant 0 : i32
    return %c0_i32, %c0_i32_0 : i32, i32
  }
  func.func @transform_2(%arg0: i32) -> (i32, i32) {
    %c0_i32 = arith.constant 0 : i32
    %c0_i32_0 = arith.constant 0 : i32
    %c0_i32_1 = arith.constant 0 : i32
    return %c0_i32, %c0_i32_0 : i32, i32
  }
  func.func @transform_3(%arg0: i32) -> (i32, i32) {
    %c0_i32 = arith.constant 0 : i32
    %c0_i32_0 = arith.constant 0 : i32
    return %arg0, %c0_i32 : i32, i32
  }
}

module attributes {stable_mosaic.version = 11 : i64} {
  func.func @_qkv_kernel(%arg0: i32, %arg1: memref<16x32xf32, #tpu.memory_space<vmem>>, %arg2: memref<32x96xf32, #tpu.memory_space<vmem>>, %arg3: memref<1x96xf32, #tpu.memory_space<vmem>>, %arg4: memref<16x32xf32, #tpu.memory_space<vmem>>, %arg5: memref<16x32xf32, #tpu.memory_space<vmem>>, %arg6: memref<16x32xf32, #tpu.memory_space<vmem>>) attributes {dimension_semantics = [#tpu.dimension_semantics<parallel>], iteration_bounds = array<i64: 1>, scalar_prefetch = 0 : i64, scratch_operands = 0 : i64, tpu.core_type = #tpu.core_type<tc>, window_params = [{transform_indices = @transform_0, window_bounds = array<i64: 16, 32>}, {pipeline_mode = #tpu.pipeline_mode<synchronous>, transform_indices = @transform_1, window_bounds = array<i64: 32, 96>}, {pipeline_mode = #tpu.pipeline_mode<synchronous>, transform_indices = @transform_2, window_bounds = array<i64: 1, 96>}, {transform_indices = @transform_3, window_bounds = array<i64: 16, 32>}, {transform_indices = @transform_4, window_bounds = array<i64: 16, 32>}, {transform_indices = @transform_5, window_bounds = array<i64: 16, 32>}]} {
    %c0 = arith.constant 0 : index
    %c0_0 = arith.constant 0 : index
    %0 = vector.load %arg1[%c0, %c0_0] : memref<16x32xf32, #tpu.memory_space<vmem>>, vector<16x32xf32>
    %c0_1 = arith.constant 0 : index
    %c0_2 = arith.constant 0 : index
    %1 = vector.load %arg2[%c0_1, %c0_2] : memref<32x96xf32, #tpu.memory_space<vmem>>, vector<32x96xf32>
    %cst = arith.constant dense<0.000000e+00> : vector<16x96xf32>
    %2 = tpu.matmul %0, %1, %cst {dimension_numbers = #tpu.dot_dimension_numbers<[1], [0], [0], [1], [0, 0, 1, 1], [], []>} : vector<16x32xf32>, vector<32x96xf32>, vector<16x96xf32> -> vector<16x96xf32>
    %c0_3 = arith.constant 0 : index
    %c0_4 = arith.constant 0 : index
    %3 = vector.load %arg3[%c0_3, %c0_4] : memref<1x96xf32, #tpu.memory_space<vmem>>, vector<1x96xf32>
    %4 = vector.broadcast %3 : vector<1x96xf32> to vector<16x96xf32>
    %5 = arith.addf %2, %4 : vector<16x96xf32>
    %6 = vector.extract_strided_slice %5 {offsets = [0, 0], sizes = [16, 32], strides = [1, 1]} : vector<16x96xf32> to vector<16x32xf32>
    %c0_5 = arith.constant 0 : index
    %c0_6 = arith.constant 0 : index
    %7 = vector.load %arg4[%c0_5, %c0_6] : memref<16x32xf32, #tpu.memory_space<vmem>>, vector<16x32xf32>
    tpu.vector_store %arg4[%c0_5, %c0_6], %6 {strides = array<i32>} : memref<16x32xf32, #tpu.memory_space<vmem>>, vector<16x32xf32>,
    %8 = vector.extract_strided_slice %5 {offsets = [0, 32], sizes = [16, 32], strides = [1, 1]} : vector<16x96xf32> to vector<16x32xf32>
    %c0_7 = arith.constant 0 : index
    %c0_8 = arith.constant 0 : index
    %9 = vector.load %arg5[%c0_7, %c0_8] : memref<16x32xf32, #tpu.memory_space<vmem>>, vector<16x32xf32>
    tpu.vector_store %arg5[%c0_7, %c0_8], %8 {strides = array<i32>} : memref<16x32xf32, #tpu.memory_space<vmem>>, vector<16x32xf32>,
    %10 = vector.extract_strided_slice %5 {offsets = [0, 64], sizes = [16, 32], strides = [1, 1]} : vector<16x96xf32> to vector<16x32xf32>
    %c0_9 = arith.constant 0 : index
    %c0_10 = arith.constant 0 : index
    %11 = vector.load %arg6[%c0_9, %c0_10] : memref<16x32xf32, #tpu.memory_space<vmem>>, vector<16x32xf32>
    tpu.vector_store %arg6[%c0_9, %c0_10], %10 {strides = array<i32>} : memref<16x32xf32, #tpu.memory_space<vmem>>, vector<16x32xf32>,
    return
  }
  func.func @transform_0(%arg0: i32) -> (i32, i32) {
    %c0_i32 = arith.constant 0 : i32
    %c0_i32_0 = arith.constant 0 : i32
    return %arg0, %c0_i32 : i32, i32
  }
  func.func @transform_1(%arg0: i32) -> (i32, i32) {
    %c0_i32 = arith.constant 0 : i32
    %c0_i32_0 = arith.constant 0 : i32
    %c0_i32_1 = arith.constant 0 : i32
    return %c0_i32, %c0_i32_0 : i32, i32
  }
  func.func @transform_2(%arg0: i32) -> (i32, i32) {
    %c0_i32 = arith.constant 0 : i32
    %c0_i32_0 = arith.constant 0 : i32
    %c0_i32_1 = arith.constant 0 : i32
    return %c0_i32, %c0_i32_0 : i32, i32
  }
  func.func @transform_3(%arg0: i32) -> (i32, i32) {
    %c0_i32 = arith.constant 0 : i32
    %c0_i32_0 = arith.constant 0 : i32
    return %arg0, %c0_i32 : i32, i32
  }
  func.func @transform_4(%arg0: i32) -> (i32, i32) {
    %c0_i32 = arith.constant 0 : i32
    %c0_i32_0 = arith.constant 0 : i32
    return %arg0, %c0_i32 : i32, i32
  }
  func.func @transform_5(%arg0: i32) -> (i32, i32) {
    %c0_i32 = arith.constant 0 : i32
    %c0_i32_0 = arith.constant 0 : i32
    return %arg0, %c0_i32 : i32, i32
  }
}

module attributes {stable_mosaic.version = 11 : i64} {
  func.func @_linear_residual_ln_kernel(%arg0: i32, %arg1: memref<16x32xf32, #tpu.memory_space<vmem>>, %arg2: memref<16x32xf32, #tpu.memory_space<vmem>>, %arg3: memref<32x32xf32, #tpu.memory_space<vmem>>, %arg4: memref<1x32xf32, #tpu.memory_space<vmem>>, %arg5: memref<1x32xf32, #tpu.memory_space<vmem>>, %arg6: memref<1x32xf32, #tpu.memory_space<vmem>>, %arg7: memref<16x32xf32, #tpu.memory_space<vmem>>) attributes {dimension_semantics = [#tpu.dimension_semantics<parallel>], iteration_bounds = array<i64: 1>, scalar_prefetch = 0 : i64, scratch_operands = 0 : i64, tpu.core_type = #tpu.core_type<tc>, window_params = [{transform_indices = @transform_0, window_bounds = array<i64: 16, 32>}, {transform_indices = @transform_1, window_bounds = array<i64: 16, 32>}, {pipeline_mode = #tpu.pipeline_mode<synchronous>, transform_indices = @transform_2, window_bounds = array<i64: 32, 32>}, {pipeline_mode = #tpu.pipeline_mode<synchronous>, transform_indices = @transform_3, window_bounds = array<i64: 1, 32>}, {pipeline_mode = #tpu.pipeline_mode<synchronous>, transform_indices = @transform_4, window_bounds = array<i64: 1, 32>}, {pipeline_mode = #tpu.pipeline_mode<synchronous>, transform_indices = @transform_5, window_bounds = array<i64: 1, 32>}, {transform_indices = @transform_6, window_bounds = array<i64: 16, 32>}]} {
    %c0 = arith.constant 0 : index
    %c0_0 = arith.constant 0 : index
    %0 = vector.load %arg1[%c0, %c0_0] : memref<16x32xf32, #tpu.memory_space<vmem>>, vector<16x32xf32>
    %c0_1 = arith.constant 0 : index
    %c0_2 = arith.constant 0 : index
    %1 = vector.load %arg3[%c0_1, %c0_2] : memref<32x32xf32, #tpu.memory_space<vmem>>, vector<32x32xf32>
    %cst = arith.constant dense<0.000000e+00> : vector<16x32xf32>
    %2 = tpu.matmul %0, %1, %cst {dimension_numbers = #tpu.dot_dimension_numbers<[1], [0], [0], [1], [0, 0, 1, 1], [], []>} : vector<16x32xf32>, vector<32x32xf32>, vector<16x32xf32> -> vector<16x32xf32>
    %c0_3 = arith.constant 0 : index
    %c0_4 = arith.constant 0 : index
    %3 = vector.load %arg4[%c0_3, %c0_4] : memref<1x32xf32, #tpu.memory_space<vmem>>, vector<1x32xf32>
    %4 = vector.broadcast %3 : vector<1x32xf32> to vector<16x32xf32>
    %5 = arith.addf %2, %4 : vector<16x32xf32>
    %c0_5 = arith.constant 0 : index
    %c0_6 = arith.constant 0 : index
    %6 = vector.load %arg2[%c0_5, %c0_6] : memref<16x32xf32, #tpu.memory_space<vmem>>, vector<16x32xf32>
    %7 = arith.addf %5, %6 : vector<16x32xf32>
    %cst_7 = arith.constant dense<0.000000e+00> : vector<16xf32>
    %8 = vector.multi_reduction <add>, %7, %cst_7 [1] : vector<16x32xf32> to vector<16xf32>
    %9 = vector.shape_cast %8 : vector<16xf32> to vector<16x1xf32>
    %cst_8 = arith.constant 3.200000e+01 : f32
    %10 = vector.broadcast %cst_8 : f32 to vector<16x1xf32>
    %11 = arith.divf %9, %10 : vector<16x1xf32>
    %12 = vector.broadcast %11 : vector<16x1xf32> to vector<16x32xf32>
    %13 = arith.subf %7, %12 : vector<16x32xf32>
    %14 = arith.mulf %13, %13 : vector<16x32xf32>
    %cst_9 = arith.constant dense<0.000000e+00> : vector<16xf32>
    %15 = vector.multi_reduction <add>, %14, %cst_9 [1] : vector<16x32xf32> to vector<16xf32>
    %16 = vector.shape_cast %15 : vector<16xf32> to vector<16x1xf32>
    %cst_10 = arith.constant 3.200000e+01 : f32
    %17 = vector.broadcast %cst_10 : f32 to vector<16x1xf32>
    %18 = arith.divf %16, %17 : vector<16x1xf32>
    %cst_11 = arith.constant 9.99999996E-13 : f32
    %19 = vector.broadcast %cst_11 : f32 to vector<16x1xf32>
    %20 = arith.addf %18, %19 : vector<16x1xf32>
    %21 = math.rsqrt %20 : vector<16x1xf32>
    %22 = vector.broadcast %21 : vector<16x1xf32> to vector<16x32xf32>
    %23 = arith.mulf %13, %22 : vector<16x32xf32>
    %c0_12 = arith.constant 0 : index
    %c0_13 = arith.constant 0 : index
    %24 = vector.load %arg5[%c0_12, %c0_13] : memref<1x32xf32, #tpu.memory_space<vmem>>, vector<1x32xf32>
    %25 = vector.broadcast %24 : vector<1x32xf32> to vector<16x32xf32>
    %26 = arith.mulf %23, %25 : vector<16x32xf32>
    %c0_14 = arith.constant 0 : index
    %c0_15 = arith.constant 0 : index
    %27 = vector.load %arg6[%c0_14, %c0_15] : memref<1x32xf32, #tpu.memory_space<vmem>>, vector<1x32xf32>
    %28 = vector.broadcast %27 : vector<1x32xf32> to vector<16x32xf32>
    %29 = arith.addf %26, %28 : vector<16x32xf32>
    %c0_16 = arith.constant 0 : index
    %c0_17 = arith.constant 0 : index
    %30 = vector.load %arg7[%c0_16, %c0_17] : memref<16x32xf32, #tpu.memory_space<vmem>>, vector<16x32xf32>
    tpu.vector_store %arg7[%c0_16, %c0_17], %29 {strides = array<i32>} : memref<16x32xf32, #tpu.memory_space<vmem>>, vector<16x32xf32>,
    return
  }
  func.func @transform_0(%arg0: i32) -> (i32, i32) {
    %c0_i32 = arith.constant 0 : i32
    %c0_i32_0 = arith.constant 0 : i32
    return %arg0, %c0_i32 : i32, i32
  }
  func.func @transform_1(%arg0: i32) -> (i32, i32) {
    %c0_i32 = arith.constant 0 : i32
    %c0_i32_0 = arith.constant 0 : i32
    return %arg0, %c0_i32 : i32, i32
  }
  func.func @transform_2(%arg0: i32) -> (i32, i32) {
    %c0_i32 = arith.constant 0 : i32
    %c0_i32_0 = arith.constant 0 : i32
    %c0_i32_1 = arith.constant 0 : i32
    return %c0_i32, %c0_i32_0 : i32, i32
  }
  func.func @transform_3(%arg0: i32) -> (i32, i32) {
    %c0_i32 = arith.constant 0 : i32
    %c0_i32_0 = arith.constant 0 : i32
    %c0_i32_1 = arith.constant 0 : i32
    return %c0_i32, %c0_i32_0 : i32, i32
  }
  func.func @transform_4(%arg0: i32) -> (i32, i32) {
    %c0_i32 = arith.constant 0 : i32
    %c0_i32_0 = arith.constant 0 : i32
    %c0_i32_1 = arith.constant 0 : i32
    return %c0_i32, %c0_i32_0 : i32, i32
  }
  func.func @transform_5(%arg0: i32) -> (i32, i32) {
    %c0_i32 = arith.constant 0 : i32
    %c0_i32_0 = arith.constant 0 : i32
    %c0_i32_1 = arith.constant 0 : i32
    return %c0_i32, %c0_i32_0 : i32, i32
  }
  func.func @transform_6(%arg0: i32) -> (i32, i32) {
    %c0_i32 = arith.constant 0 : i32
    %c0_i32_0 = arith.constant 0 : i32
    return %arg0, %c0_i32 : i32, i32
  }
}

module attributes {stable_mosaic.version = 11 : i64} {
  func.func @_attention_kernel(%arg0: i32, %arg1: i32, %arg2: memref<1x8x32xf32, #tpu.memory_space<vmem>>, %arg3: memref<1x8x32xf32, #tpu.memory_space<vmem>>, %arg4: memref<1x8x32xf32, #tpu.memory_space<vmem>>, %arg5: memref<1x1x8xf32, #tpu.memory_space<vmem>>, %arg6: memref<1x8x32xf32, #tpu.memory_space<vmem>>) attributes {dimension_semantics = [#tpu.dimension_semantics<parallel>, #tpu.dimension_semantics<parallel>], iteration_bounds = array<i64: 2, 1>, scalar_prefetch = 0 : i64, scratch_operands = 0 : i64, tpu.core_type = #tpu.core_type<tc>, window_params = [{transform_indices = @transform_0, window_bounds = array<i64: 1, 8, 32>}, {transform_indices = @transform_1, window_bounds = array<i64: 1, 8, 32>}, {transform_indices = @transform_2, window_bounds = array<i64: 1, 8, 32>}, {transform_indices = @transform_3, window_bounds = array<i64: 1, 1, 8>}, {transform_indices = @transform_4, window_bounds = array<i64: 1, 8, 32>}]} {
    %c0 = arith.constant 0 : index
    %c0_0 = arith.constant 0 : index
    %c0_1 = arith.constant 0 : index
    %0 = vector.load %arg5[%c0, %c0_0, %c0_1] : memref<1x1x8xf32, #tpu.memory_space<vmem>>, vector<1x1x8xf32>
    %1 = vector.shape_cast %0 : vector<1x1x8xf32> to vector<1x8xf32>
    %c0_2 = arith.constant 0 : index
    %c0_3 = arith.constant 0 : index
    %c0_4 = arith.constant 0 : index
    %2 = vector.load %arg2[%c0_2, %c0_3, %c0_4] : memref<1x8x32xf32, #tpu.memory_space<vmem>>, vector<1x8x32xf32>
    %3 = vector.shape_cast %2 : vector<1x8x32xf32> to vector<8x32xf32>
    %c0_5 = arith.constant 0 : index
    %c0_6 = arith.constant 0 : index
    %c0_7 = arith.constant 0 : index
    %4 = vector.load %arg3[%c0_5, %c0_6, %c0_7] : memref<1x8x32xf32, #tpu.memory_space<vmem>>, vector<1x8x32xf32>
    %5 = vector.shape_cast %4 : vector<1x8x32xf32> to vector<8x32xf32>
    %c0_8 = arith.constant 0 : index
    %c0_9 = arith.constant 0 : index
    %c0_10 = arith.constant 0 : index
    %6 = vector.load %arg4[%c0_8, %c0_9, %c0_10] : memref<1x8x32xf32, #tpu.memory_space<vmem>>, vector<1x8x32xf32>
    %7 = vector.shape_cast %6 : vector<1x8x32xf32> to vector<8x32xf32>
    %8 = vector.extract_strided_slice %3 {offsets = [0, 0], sizes = [8, 8], strides = [1, 1]} : vector<8x32xf32> to vector<8x8xf32>
    %cst = arith.constant 0.353553385 : f32
    %9 = vector.broadcast %cst : f32 to vector<8x8xf32>
    %10 = arith.mulf %8, %9 : vector<8x8xf32>
    %11 = vector.extract_strided_slice %5 {offsets = [0, 0], sizes = [8, 8], strides = [1, 1]} : vector<8x32xf32> to vector<8x8xf32>
    %12 = vector.extract_strided_slice %7 {offsets = [0, 0], sizes = [8, 8], strides = [1, 1]} : vector<8x32xf32> to vector<8x8xf32>
    %cst_11 = arith.constant dense<0.000000e+00> : vector<8x8xf32>
    %13 = tpu.matmul %10, %11, %cst_11 {dimension_numbers = #tpu.dot_dimension_numbers<[1], [1], [0], [0], [0, 0, 1, 0], [], []>} : vector<8x8xf32>, vector<8x8xf32>, vector<8x8xf32> -> vector<8x8xf32>
    %14 = vector.broadcast %1 : vector<1x8xf32> to vector<8x8xf32>
    %15 = arith.addf %13, %14 : vector<8x8xf32>
    %cst_12 = arith.constant dense<0xFF800000> : vector<8xf32>
    %16 = vector.multi_reduction <maximumf>, %15, %cst_12 [1] : vector<8x8xf32> to vector<8xf32>
    %17 = vector.shape_cast %16 : vector<8xf32> to vector<8x1xf32>
    %18 = vector.broadcast %17 : vector<8x1xf32> to vector<8x8xf32>
    %19 = arith.subf %15, %18 : vector<8x8xf32>
    %20 = math.exp %19 : vector<8x8xf32>
    %cst_13 = arith.constant dense<0.000000e+00> : vector<8xf32>
    %21 = vector.multi_reduction <add>, %20, %cst_13 [1] : vector<8x8xf32> to vector<8xf32>
    %22 = vector.shape_cast %21 : vector<8xf32> to vector<8x1xf32>
    %cst_14 = arith.constant dense<0.000000e+00> : vector<8x8xf32>
    %23 = tpu.matmul %20, %12, %cst_14 {dimension_numbers = #tpu.dot_dimension_numbers<[1], [0], [0], [1], [0, 0, 1, 1], [], []>} : vector<8x8xf32>, vector<8x8xf32>, vector<8x8xf32> -> vector<8x8xf32>
    %24 = tpu.reciprocal %22 : vector<8x1xf32> -> vector<8x1xf32>
    %25 = vector.broadcast %24 : vector<8x1xf32> to vector<8x8xf32>
    %26 = arith.mulf %23, %25 : vector<8x8xf32>
    %27 = vector.extract_strided_slice %3 {offsets = [0, 8], sizes = [8, 8], strides = [1, 1]} : vector<8x32xf32> to vector<8x8xf32>
    %cst_15 = arith.constant 0.353553385 : f32
    %28 = vector.broadcast %cst_15 : f32 to vector<8x8xf32>
    %29 = arith.mulf %27, %28 : vector<8x8xf32>
    %30 = vector.extract_strided_slice %5 {offsets = [0, 8], sizes = [8, 8], strides = [1, 1]} : vector<8x32xf32> to vector<8x8xf32>
    %31 = vector.extract_strided_slice %7 {offsets = [0, 8], sizes = [8, 8], strides = [1, 1]} : vector<8x32xf32> to vector<8x8xf32>
    %cst_16 = arith.constant dense<0.000000e+00> : vector<8x8xf32>
    %32 = tpu.matmul %29, %30, %cst_16 {dimension_numbers = #tpu.dot_dimension_numbers<[1], [1], [0], [0], [0, 0, 1, 0], [], []>} : vector<8x8xf32>, vector<8x8xf32>, vector<8x8xf32> -> vector<8x8xf32>
    %33 = vector.broadcast %1 : vector<1x8xf32> to vector<8x8xf32>
    %34 = arith.addf %32, %33 : vector<8x8xf32>
    %cst_17 = arith.constant dense<0xFF800000> : vector<8xf32>
    %35 = vector.multi_reduction <maximumf>, %34, %cst_17 [1] : vector<8x8xf32> to vector<8xf32>
    %36 = vector.shape_cast %35 : vector<8xf32> to vector<8x1xf32>
    %37 = vector.broadcast %36 : vector<8x1xf32> to vector<8x8xf32>
    %38 = arith.subf %34, %37 : vector<8x8xf32>
    %39 = math.exp %38 : vector<8x8xf32>
    %cst_18 = arith.constant dense<0.000000e+00> : vector<8xf32>
    %40 = vector.multi_reduction <add>, %39, %cst_18 [1] : vector<8x8xf32> to vector<8xf32>
    %41 = vector.shape_cast %40 : vector<8xf32> to vector<8x1xf32>
    %cst_19 = arith.constant dense<0.000000e+00> : vector<8x8xf32>
    %42 = tpu.matmul %39, %31, %cst_19 {dimension_numbers = #tpu.dot_dimension_numbers<[1], [0], [0], [1], [0, 0, 1, 1], [], []>} : vector<8x8xf32>, vector<8x8xf32>, vector<8x8xf32> -> vector<8x8xf32>
    %43 = tpu.reciprocal %41 : vector<8x1xf32> -> vector<8x1xf32>
    %44 = vector.broadcast %43 : vector<8x1xf32> to vector<8x8xf32>
    %45 = arith.mulf %42, %44 : vector<8x8xf32>
    %46 = vector.extract_strided_slice %3 {offsets = [0, 16], sizes = [8, 8], strides = [1, 1]} : vector<8x32xf32> to vector<8x8xf32>
    %cst_20 = arith.constant 0.353553385 : f32
    %47 = vector.broadcast %cst_20 : f32 to vector<8x8xf32>
    %48 = arith.mulf %46, %47 : vector<8x8xf32>
    %49 = vector.extract_strided_slice %5 {offsets = [0, 16], sizes = [8, 8], strides = [1, 1]} : vector<8x32xf32> to vector<8x8xf32>
    %50 = vector.extract_strided_slice %7 {offsets = [0, 16], sizes = [8, 8], strides = [1, 1]} : vector<8x32xf32> to vector<8x8xf32>
    %cst_21 = arith.constant dense<0.000000e+00> : vector<8x8xf32>
    %51 = tpu.matmul %48, %49, %cst_21 {dimension_numbers = #tpu.dot_dimension_numbers<[1], [1], [0], [0], [0, 0, 1, 0], [], []>} : vector<8x8xf32>, vector<8x8xf32>, vector<8x8xf32> -> vector<8x8xf32>
    %52 = vector.broadcast %1 : vector<1x8xf32> to vector<8x8xf32>
    %53 = arith.addf %51, %52 : vector<8x8xf32>
    %cst_22 = arith.constant dense<0xFF800000> : vector<8xf32>
    %54 = vector.multi_reduction <maximumf>, %53, %cst_22 [1] : vector<8x8xf32> to vector<8xf32>
    %55 = vector.shape_cast %54 : vector<8xf32> to vector<8x1xf32>
    %56 = vector.broadcast %55 : vector<8x1xf32> to vector<8x8xf32>
    %57 = arith.subf %53, %56 : vector<8x8xf32>
    %58 = math.exp %57 : vector<8x8xf32>
    %cst_23 = arith.constant dense<0.000000e+00> : vector<8xf32>
    %59 = vector.multi_reduction <add>, %58, %cst_23 [1] : vector<8x8xf32> to vector<8xf32>
    %60 = vector.shape_cast %59 : vector<8xf32> to vector<8x1xf32>
    %cst_24 = arith.constant dense<0.000000e+00> : vector<8x8xf32>
    %61 = tpu.matmul %58, %50, %cst_24 {dimension_numbers = #tpu.dot_dimension_numbers<[1], [0], [0], [1], [0, 0, 1, 1], [], []>} : vector<8x8xf32>, vector<8x8xf32>, vector<8x8xf32> -> vector<8x8xf32>
    %62 = tpu.reciprocal %60 : vector<8x1xf32> -> vector<8x1xf32>
    %63 = vector.broadcast %62 : vector<8x1xf32> to vector<8x8xf32>
    %64 = arith.mulf %61, %63 : vector<8x8xf32>
    %65 = vector.extract_strided_slice %3 {offsets = [0, 24], sizes = [8, 8], strides = [1, 1]} : vector<8x32xf32> to vector<8x8xf32>
    %cst_25 = arith.constant 0.353553385 : f32
    %66 = vector.broadcast %cst_25 : f32 to vector<8x8xf32>
    %67 = arith.mulf %65, %66 : vector<8x8xf32>
    %68 = vector.extract_strided_slice %5 {offsets = [0, 24], sizes = [8, 8], strides = [1, 1]} : vector<8x32xf32> to vector<8x8xf32>
    %69 = vector.extract_strided_slice %7 {offsets = [0, 24], sizes = [8, 8], strides = [1, 1]} : vector<8x32xf32> to vector<8x8xf32>
    %cst_26 = arith.constant dense<0.000000e+00> : vector<8x8xf32>
    %70 = tpu.matmul %67, %68, %cst_26 {dimension_numbers = #tpu.dot_dimension_numbers<[1], [1], [0], [0], [0, 0, 1, 0], [], []>} : vector<8x8xf32>, vector<8x8xf32>, vector<8x8xf32> -> vector<8x8xf32>
    %71 = vector.broadcast %1 : vector<1x8xf32> to vector<8x8xf32>
    %72 = arith.addf %70, %71 : vector<8x8xf32>
    %cst_27 = arith.constant dense<0xFF800000> : vector<8xf32>
    %73 = vector.multi_reduction <maximumf>, %72, %cst_27 [1] : vector<8x8xf32> to vector<8xf32>
    %74 = vector.shape_cast %73 : vector<8xf32> to vector<8x1xf32>
    %75 = vector.broadcast %74 : vector<8x1xf32> to vector<8x8xf32>
    %76 = arith.subf %72, %75 : vector<8x8xf32>
    %77 = math.exp %76 : vector<8x8xf32>
    %cst_28 = arith.constant dense<0.000000e+00> : vector<8xf32>
    %78 = vector.multi_reduction <add>, %77, %cst_28 [1] : vector<8x8xf32> to vector<8xf32>
    %79 = vector.shape_cast %78 : vector<8xf32> to vector<8x1xf32>
    %cst_29 = arith.constant dense<0.000000e+00> : vector<8x8xf32>
    %80 = tpu.matmul %77, %69, %cst_29 {dimension_numbers = #tpu.dot_dimension_numbers<[1], [0], [0], [1], [0, 0, 1, 1], [], []>} : vector<8x8xf32>, vector<8x8xf32>, vector<8x8xf32> -> vector<8x8xf32>
    %81 = tpu.reciprocal %79 : vector<8x1xf32> -> vector<8x1xf32>
    %82 = vector.broadcast %81 : vector<8x1xf32> to vector<8x8xf32>
    %83 = arith.mulf %80, %82 : vector<8x8xf32>
    %84 = tpu.concatenate %26, %45, %64, %83 in 1 : vector<8x8xf32>, vector<8x8xf32>, vector<8x8xf32>, vector<8x8xf32> -> vector<8x32xf32>
    %85 = vector.shape_cast %84 : vector<8x32xf32> to vector<1x8x32xf32>
    %c0_30 = arith.constant 0 : index
    %c0_31 = arith.constant 0 : index
    %c0_32 = arith.constant 0 : index
    %86 = vector.load %arg6[%c0_30, %c0_31, %c0_32] : memref<1x8x32xf32, #tpu.memory_space<vmem>>, vector<1x8x32xf32>
    tpu.vector_store %arg6[%c0_30, %c0_31, %c0_32], %85 {strides = array<i32>} : memref<1x8x32xf32, #tpu.memory_space<vmem>>, vector<1x8x32xf32>,
    return
  }
  func.func @transform_0(%arg0: i32, %arg1: i32) -> (i32, i32, i32) {
    %c0_i32 = arith.constant 0 : i32
    %c0_i32_0 = arith.constant 0 : i32
    return %arg0, %c0_i32, %arg1 : i32, i32, i32
  }
  func.func @transform_1(%arg0: i32, %arg1: i32) -> (i32, i32, i32) {
    %c0_i32 = arith.constant 0 : i32
    %c0_i32_0 = arith.constant 0 : i32
    return %arg0, %c0_i32, %arg1 : i32, i32, i32
  }
  func.func @transform_2(%arg0: i32, %arg1: i32) -> (i32, i32, i32) {
    %c0_i32 = arith.constant 0 : i32
    %c0_i32_0 = arith.constant 0 : i32
    return %arg0, %c0_i32, %arg1 : i32, i32, i32
  }
  func.func @transform_3(%arg0: i32, %arg1: i32) -> (i32, i32, i32) {
    %c0_i32 = arith.constant 0 : i32
    %c0_i32_0 = arith.constant 0 : i32
    %c0_i32_1 = arith.constant 0 : i32
    return %arg0, %c0_i32, %c0_i32_0 : i32, i32, i32
  }
  func.func @transform_4(%arg0: i32, %arg1: i32) -> (i32, i32, i32) {
    %c0_i32 = arith.constant 0 : i32
    %c0_i32_0 = arith.constant 0 : i32
    return %arg0, %c0_i32, %arg1 : i32, i32, i32
  }
}

module attributes {stable_mosaic.version = 11 : i64} {
  func.func @_linear_residual_ln_kernel(%arg0: i32, %arg1: memref<16x128xf32, #tpu.memory_space<vmem>>, %arg2: memref<16x32xf32, #tpu.memory_space<vmem>>, %arg3: memref<128x32xf32, #tpu.memory_space<vmem>>, %arg4: memref<1x32xf32, #tpu.memory_space<vmem>>, %arg5: memref<1x32xf32, #tpu.memory_space<vmem>>, %arg6: memref<1x32xf32, #tpu.memory_space<vmem>>, %arg7: memref<16x32xf32, #tpu.memory_space<vmem>>) attributes {dimension_semantics = [#tpu.dimension_semantics<parallel>], iteration_bounds = array<i64: 1>, scalar_prefetch = 0 : i64, scratch_operands = 0 : i64, tpu.core_type = #tpu.core_type<tc>, window_params = [{transform_indices = @transform_0, window_bounds = array<i64: 16, 128>}, {transform_indices = @transform_1, window_bounds = array<i64: 16, 32>}, {pipeline_mode = #tpu.pipeline_mode<synchronous>, transform_indices = @transform_2, window_bounds = array<i64: 128, 32>}, {pipeline_mode = #tpu.pipeline_mode<synchronous>, transform_indices = @transform_3, window_bounds = array<i64: 1, 32>}, {pipeline_mode = #tpu.pipeline_mode<synchronous>, transform_indices = @transform_4, window_bounds = array<i64: 1, 32>}, {pipeline_mode = #tpu.pipeline_mode<synchronous>, transform_indices = @transform_5, window_bounds = array<i64: 1, 32>}, {transform_indices = @transform_6, window_bounds = array<i64: 16, 32>}]} {
    %c0 = arith.constant 0 : index
    %c0_0 = arith.constant 0 : index
    %0 = vector.load %arg1[%c0, %c0_0] : memref<16x128xf32, #tpu.memory_space<vmem>>, vector<16x128xf32>
    %c0_1 = arith.constant 0 : index
    %c0_2 = arith.constant 0 : index
    %1 = vector.load %arg3[%c0_1, %c0_2] : memref<128x32xf32, #tpu.memory_space<vmem>>, vector<128x32xf32>
    %cst = arith.constant dense<0.000000e+00> : vector<16x32xf32>
    %2 = tpu.matmul %0, %1, %cst {dimension_numbers = #tpu.dot_dimension_numbers<[1], [0], [0], [1], [0, 0, 1, 1], [], []>} : vector<16x128xf32>, vector<128x32xf32>, vector<16x32xf32> -> vector<16x32xf32>
    %c0_3 = arith.constant 0 : index
    %c0_4 = arith.constant 0 : index
    %3 = vector.load %arg4[%c0_3, %c0_4] : memref<1x32xf32, #tpu.memory_space<vmem>>, vector<1x32xf32>
    %4 = vector.broadcast %3 : vector<1x32xf32> to vector<16x32xf32>
    %5 = arith.addf %2, %4 : vector<16x32xf32>
    %c0_5 = arith.constant 0 : index
    %c0_6 = arith.constant 0 : index
    %6 = vector.load %arg2[%c0_5, %c0_6] : memref<16x32xf32, #tpu.memory_space<vmem>>, vector<16x32xf32>
    %7 = arith.addf %5, %6 : vector<16x32xf32>
    %cst_7 = arith.constant dense<0.000000e+00> : vector<16xf32>
    %8 = vector.multi_reduction <add>, %7, %cst_7 [1] : vector<16x32xf32> to vector<16xf32>
    %9 = vector.shape_cast %8 : vector<16xf32> to vector<16x1xf32>
    %cst_8 = arith.constant 3.200000e+01 : f32
    %10 = vector.broadcast %cst_8 : f32 to vector<16x1xf32>
    %11 = arith.divf %9, %10 : vector<16x1xf32>
    %12 = vector.broadcast %11 : vector<16x1xf32> to vector<16x32xf32>
    %13 = arith.subf %7, %12 : vector<16x32xf32>
    %14 = arith.mulf %13, %13 : vector<16x32xf32>
    %cst_9 = arith.constant dense<0.000000e+00> : vector<16xf32>
    %15 = vector.multi_reduction <add>, %14, %cst_9 [1] : vector<16x32xf32> to vector<16xf32>
    %16 = vector.shape_cast %15 : vector<16xf32> to vector<16x1xf32>
    %cst_10 = arith.constant 3.200000e+01 : f32
    %17 = vector.broadcast %cst_10 : f32 to vector<16x1xf32>
    %18 = arith.divf %16, %17 : vector<16x1xf32>
    %cst_11 = arith.constant 9.99999996E-13 : f32
    %19 = vector.broadcast %cst_11 : f32 to vector<16x1xf32>
    %20 = arith.addf %18, %19 : vector<16x1xf32>
    %21 = math.rsqrt %20 : vector<16x1xf32>
    %22 = vector.broadcast %21 : vector<16x1xf32> to vector<16x32xf32>
    %23 = arith.mulf %13, %22 : vector<16x32xf32>
    %c0_12 = arith.constant 0 : index
    %c0_13 = arith.constant 0 : index
    %24 = vector.load %arg5[%c0_12, %c0_13] : memref<1x32xf32, #tpu.memory_space<vmem>>, vector<1x32xf32>
    %25 = vector.broadcast %24 : vector<1x32xf32> to vector<16x32xf32>
    %26 = arith.mulf %23, %25 : vector<16x32xf32>
    %c0_14 = arith.constant 0 : index
    %c0_15 = arith.constant 0 : index
    %27 = vector.load %arg6[%c0_14, %c0_15] : memref<1x32xf32, #tpu.memory_space<vmem>>, vector<1x32xf32>
    %28 = vector.broadcast %27 : vector<1x32xf32> to vector<16x32xf32>
    %29 = arith.addf %26, %28 : vector<16x32xf32>
    %c0_16 = arith.constant 0 : index
    %c0_17 = arith.constant 0 : index
    %30 = vector.load %arg7[%c0_16, %c0_17] : memref<16x32xf32, #tpu.memory_space<vmem>>, vector<16x32xf32>
    tpu.vector_store %arg7[%c0_16, %c0_17], %29 {strides = array<i32>} : memref<16x32xf32, #tpu.memory_space<vmem>>, vector<16x32xf32>,
    return
  }
  func.func @transform_0(%arg0: i32) -> (i32, i32) {
    %c0_i32 = arith.constant 0 : i32
    %c0_i32_0 = arith.constant 0 : i32
    return %arg0, %c0_i32 : i32, i32
  }
  func.func @transform_1(%arg0: i32) -> (i32, i32) {
    %c0_i32 = arith.constant 0 : i32
    %c0_i32_0 = arith.constant 0 : i32
    return %arg0, %c0_i32 : i32, i32
  }
  func.func @transform_2(%arg0: i32) -> (i32, i32) {
    %c0_i32 = arith.constant 0 : i32
    %c0_i32_0 = arith.constant 0 : i32
    %c0_i32_1 = arith.constant 0 : i32
    return %c0_i32, %c0_i32_0 : i32, i32
  }
  func.func @transform_3(%arg0: i32) -> (i32, i32) {
    %c0_i32 = arith.constant 0 : i32
    %c0_i32_0 = arith.constant 0 : i32
    %c0_i32_1 = arith.constant 0 : i32
    return %c0_i32, %c0_i32_0 : i32, i32
  }
  func.func @transform_4(%arg0: i32) -> (i32, i32) {
    %c0_i32 = arith.constant 0 : i32
    %c0_i32_0 = arith.constant 0 : i32
    %c0_i32_1 = arith.constant 0 : i32
    return %c0_i32, %c0_i32_0 : i32, i32
  }
  func.func @transform_5(%arg0: i32) -> (i32, i32) {
    %c0_i32 = arith.constant 0 : i32
    %c0_i32_0 = arith.constant 0 : i32
    %c0_i32_1 = arith.constant 0 : i32
    return %c0_i32, %c0_i32_0 : i32, i32
  }
  func.func @transform_6(%arg0: i32) -> (i32, i32) {
    %c0_i32 = arith.constant 0 : i32
    %c0_i32_0 = arith.constant 0 : i32
    return %arg0, %c0_i32 : i32, i32
  }
}

</mosaic_0001>

<bundles_post_ra>
// kernel: bert_layer_forward.5
= control target key start
LH: loop header
LB: loop body
LE: loop exit
PB: predicated region body
PF: predicated region fallthrough
CT: control target
= control target key end

     0   :  { %11 = vsyncpa [#allocation3], 0  ;;  %s206_s18 = smov [#allocation2]   ;;  %s279_s0 = inlined_call_operand.vmem [shape: f32[16,32], index: 0, kind: input, shape index: {}]   ;;  %s280_s1 = inlined_call_operand.hbm [shape: f32[32,96], index: 1, kind: input, shape index: {}]   ;;  %s281_s2 = inlined_call_operand.vmem [shape: f32[1,96], index: 2, kind: input, shape index: {}]   ;;  %s282_s3 = inlined_call_operand.vmem [shape: f32[16,32], index: 3, kind: output, shape index: {0}]   ;;  %s283_s4 = inlined_call_operand.vmem [shape: f32[16,32], index: 4, kind: output, shape index: {1}]   ;;  %s284_s5 = inlined_call_operand.vmem [shape: f32[16,32], index: 5, kind: output, shape index: {2}]  }
   0x1   :  { %s19_s19 = sshll.u32 %s206_s18, 4  ;;  %s20_s19 = int_to_ptr.vmem [resolvable:$true] %s19_s19 }
   0x2   :  { %s192_s20 = scalar_lea.vmem %s20_s19, 512  ;;  %p197_p1 = scmp.lt.s32.totalorder %s20_s19, %s20_s19 }
   0x3   :  { %p193_p0 = scmp.ne.s32.totalorder %s20_s19, %s192_s20  ;;  %p198_p2 = scmp.lt.s32.totalorder %s192_s20, %s192_s20 }
   0x5   :  { %p199_p3 = por %p198_p2, %p197_p1 }
   0x7   :  { %p200_p4 = pnand %p199_p3, %p193_p0 }
   0x9   :  { %203 = shalt.err (!%p200_p4)
}
   0xa   :  { %s207_s21 = smov 128   ;;  %s208_s22 = smov 8  }
   0xb   :  { %25 = dma.hbm_to_vmem [thread:$0]  %s280_s1, 512, %s20_s19, [#allocation3], %s207_s21, %s207_s21, %s208_s22  }
   0xc   :  { %204 = dma.done.wait [#allocation3], 512  }
   0xd   :  { %205 = vsyncadd [#allocation3], 4294966784  ;;  %vm44_vm0 = vcmask 261120   ;;  %v36_v0 = vld [vmem:[#allocation2 + $0x18] sm:$0xff]  ;;  %v35_v1 = vld [vmem:[#allocation2 + $0x10] sm:$0xff]  ;;  %s209_s8 = smov 64  }
   0xe   :  { %168 = vmatprep.subr.mxu0 %v36_v0  ;;  %v31_v2 = vld [vmem:[%s279_s0] sm:$0xff]  ;;  %v34_v3 = vld [vmem:[#allocation2 + $0x8] sm:$0xff]  ;;  %s210_s9 = smov 96  }
   0xf   :  { %169 = vmatpush3.msra.mxu0 %v36_v0  ;;  %176 = vmatprep.mubr.msk.f32.mxu0 %vm44_vm0, %v31_v2  ;;  %v33_v4 = vld [vmem:[#allocation2] sm:$0xff]  ;;  %v32_v5 = vld [vmem:[%s279_s0 + $0x8] sm:$0xff] }
  0x10   :  { %170 = vmatprep.subr.mxu0 %v35_v1  ;;  %v159_v6 = vld [vmem:[%s281_s2] ss:$0 sm:$0xff] }
  0x11   :  { %171 = vmatpush3.msra.mxu0 %v35_v1 }
  0x12   :  { %172 = vmatprep.subr.mxu0 %v34_v3 }
  0x13   :  { %173 = vmatpush3.msra.mxu0 %v34_v3 }
  0x14   :  { %174 = vmatprep.subr.mxu0 %v33_v4 }
  0x15   :  { %175 = vmatpush3.msra.mxu0 %v33_v4 }
  0x16   :  { %177 = vmatmul.mubr.msk.f32.vlgmr.msra.gmra.mxu0 %vm44_vm0, %v32_v5 }
  0xd6   :  { %v178_v7 = vpop.f32.mrf.mxu0 }
  0xd7   :  { %v123_v8 = vadd.f32 %v178_v7, %v159_v6 }
  0xd8   :  { %v117_v9 = vpop.f32.mrf.mxu0 }
  0xd9   :  { %127 = vst.msk [vmem:[%s282_s3 + $0x8] sm:$0xff] %vm44_vm0, %v123_v8  ;;  %v118_v10 = vadd.f32 %v159_v6, %v117_v9 }
  0xdb   :  { %126 = vst.msk [vmem:[%s282_s3] sm:$0xff] %vm44_vm0, %v118_v10  ;;  %138 = vrot.lane.b32.xlu1 %v118_v10, %s209_s8  ;;  %130 = vrot.lane.b32.xlu0 %v118_v10, %s210_s9 }
  0xdf   :  { %140 = vrot.lane.b32.xlu1 %v123_v8, %s209_s8  ;;  %132 = vrot.lane.b32.xlu0 %v123_v8, %s210_s9 }
 0x14d   :  { %v139_v11 = vpop.permute.xlu1 %138  ;;  %v131_v12 = vpop.permute.xlu0 %130 }
 0x14e   :  { %144 = vst.msk [vmem:[%s284_s5] sm:$0xff] %vm44_vm0, %v139_v11  ;;  %136 = vst.msk [vmem:[%s283_s4] sm:$0xff] %vm44_vm0, %v131_v12 }
 0x151   :  { %v141_v13 = vpop.permute.xlu1 %140  ;;  %v133_v14 = vpop.permute.xlu0 %132 }
 0x152   :  { %145 = vst.msk [vmem:[%s284_s5 + $0x8] sm:$0xff] %vm44_vm0, %v141_v13  ;;  %137 = vst.msk [vmem:[%s283_s4 + $0x8] sm:$0xff] %vm44_vm0, %v133_v14 }
 0x153   :  { %158 = vsyncpa [#allocation3], 1 }

// kernel: bert_layer_forward.8
= control target key start
LH: loop header
LB: loop body
LE: loop exit
PB: predicated region body
PF: predicated region fallthrough
CT: control target
= control target key end

     0   :  { %vm27_vm0 = vcmask 261120   ;;  %s244_s1 = inlined_call_operand.vmem [shape: f32[32,128], index: 1, kind: input, shape index: {}]   ;;  %s245_s0 = inlined_call_operand.vmem [shape: f32[16,32], index: 0, kind: input, shape index: {}]   ;;  %s246_s2 = inlined_call_operand.vmem [shape: f32[1,128], index: 2, kind: input, shape index: {}]   ;;  %s247_s3 = inlined_call_operand.vmem [shape: f32[16,128], index: 3, kind: output, shape index: {}]  }
   0x1   :  { %v19_v0 = vld [vmem:[%s244_s1 + $0x18] sm:$0xff]  ;;  %v18_v1 = vld [vmem:[%s244_s1 + $0x10] sm:$0xff]  ;;  %v14_v2 = vld [vmem:[%s245_s0] sm:$0xff] }
   0x2   :  { %176 = vmatprep.subr.mxu0 %v19_v0  ;;  %v17_v3 = vld [vmem:[%s244_s1 + $0x8] sm:$0xff]  ;;  %184 = vmatprep.mubr.msk.f32.mxu0 %vm27_vm0, %v14_v2  ;;  %v16_v4 = vld [vmem:[%s244_s1] sm:$0xff] }
   0x3   :  { %177 = vmatpush3.msra.mxu0 %v19_v0  ;;  %v15_v5 = vld [vmem:[%s245_s0 + $0x8] sm:$0xff]  ;;  %v167_v6 = vld [vmem:[%s246_s2] ss:$0 sm:$0xff] }
   0x4   :  { %178 = vmatprep.subr.mxu0 %v18_v1 }
   0x5   :  { %179 = vmatpush3.msra.mxu0 %v18_v1 }
   0x6   :  { %180 = vmatprep.subr.mxu0 %v17_v3 }
   0x7   :  { %181 = vmatpush3.msra.mxu0 %v17_v3 }
   0x8   :  { %182 = vmatprep.subr.mxu0 %v16_v4 }
   0x9   :  { %183 = vmatpush3.msra.mxu0 %v16_v4 }
   0xa   :  { %185 = vmatmul.mubr.msk.f32.vlgmr.msra.gmra.mxu0 %vm27_vm0, %v15_v5 }
  0xca   :  { %v186_v7 = vpop.f32.mrf.mxu0 }
  0xcb   :  { %v106_v8 = vadd.f32 %v186_v7, %v167_v6 }
  0xcc   :  { %v100_v9 = vpop.f32.mrf.mxu0 }
  0xcd   :  { %v112_v10 = vmul.f32 0.70710677, %v106_v8  ;;  %v101_v11 = vadd.f32 %v167_v6, %v100_v9  ;;  %v110_v53 = vmul.f32 0.5, %v106_v8 }
  0xcf   :  { %v114_v12 = vand.u32 2147483647, %v112_v10  ;;  %v111_v13 = vmul.f32 0.70710677, %v101_v11  ;;  %vm152_vm1 = vcmp.ge.f32.partialorder %v112_v10, 0.0  ;;  %v109_v58 = vmul.f32 0.5, %v101_v11 }
  0xd1   :  { %v116_v14 = vmul.f32 0.3275911, %v114_v12  ;;  %v113_v15 = vand.u32 2147483647, %v111_v13  ;;  %v140_v19 = vsub.f32 0.0, %v114_v12  ;;  %vm151_vm2 = vcmp.ge.f32.partialorder %v111_v13, 0.0 }
  0xd3   :  { %v118_v16 = vadd.f32 1.0, %v116_v14  ;;  %v115_v17 = vmul.f32 0.3275911, %v113_v15  ;;  %v139_v20 = vsub.f32 0.0, %v113_v15  ;;  %v142_v21 = vmul.f32 %v140_v19, %v114_v12 }
  0xd5   :  { %187 = vrcp.f32 %v118_v16  ;;  %v117_v18 = vadd.f32 1.0, %v115_v17  ;;  %v141_v23 = vmul.f32 %v139_v20, %v113_v15  ;;  %v145_v25 = vmul.f32 1.442695, %v142_v21 }
  0xd7   :  { %189 = vrcp.f32 %v117_v18  ;;  %v143_v29 = vmul.f32 1.442695, %v141_v23 }
  0xd8   :  { %191 = vpow2.f32 %v145_v25 }
  0xd9   :  { %193 = vpow2.f32 %v143_v29 }
  0xe2   :  { %v188_v22 = vpop.eup %187 }
  0xe3   :  { %v122_v24 = vmul.f32 1.0614054, %v188_v22 }
  0xe4   :  { %v190_v26 = vpop.eup %189 }
  0xe5   :  { %v124_v27 = vadd.f32 -1.4531521, %v122_v24  ;;  %v121_v28 = vmul.f32 1.0614054, %v190_v26  ;;  %v192_v43 = vpop.eup %191 }
  0xe6   :  { %v194_v47 = vpop.eup %193 }
  0xe7   :  { %v126_v30 = vmul.f32 %v188_v22, %v124_v27  ;;  %v123_v31 = vadd.f32 -1.4531521, %v121_v28 }
  0xe9   :  { %v128_v32 = vadd.f32 1.4214138, %v126_v30  ;;  %v125_v33 = vmul.f32 %v190_v26, %v123_v31 }
  0xeb   :  { %v130_v34 = vmul.f32 %v188_v22, %v128_v32  ;;  %v127_v35 = vadd.f32 1.4214138, %v125_v33 }
  0xed   :  { %v132_v36 = vadd.f32 -0.28449672, %v130_v34  ;;  %v129_v37 = vmul.f32 %v190_v26, %v127_v35 }
  0xef   :  { %v134_v38 = vmul.f32 %v188_v22, %v132_v36  ;;  %v131_v39 = vadd.f32 -0.28449672, %v129_v37 }
  0xf1   :  { %v136_v40 = vadd.f32 0.2548296, %v134_v38  ;;  %v133_v41 = vmul.f32 %v190_v26, %v131_v39 }
  0xf3   :  { %v138_v42 = vmul.f32 %v188_v22, %v136_v40  ;;  %v135_v44 = vadd.f32 0.2548296, %v133_v41 }
  0xf5   :  { %v148_v45 = vmul.f32 %v192_v43, %v138_v42  ;;  %v137_v46 = vmul.f32 %v190_v26, %v135_v44 }
  0xf7   :  { %v150_v48 = vsub.f32 1.0, %v148_v45  ;;  %v147_v49 = vmul.f32 %v194_v47, %v137_v46 }
  0xf9   :  { %v154_v50 = vsub.f32 0.0, %v150_v48  ;;  %v149_v51 = vsub.f32 1.0, %v147_v49 }
  0xfb   :  { %v156_v52 = vsel %vm152_vm1, %v150_v48, %v154_v50  ;;  %v153_v55 = vsub.f32 0.0, %v149_v51 }
  0xfc   :  { %v158_v54 = vadd.f32 1.0, %v156_v52 }
  0xfd   :  { %v155_v57 = vsel %vm151_vm2, %v149_v51, %v153_v55 }
  0xfe   :  { %v160_v56 = vmul.f32 %v158_v54, %v110_v53  ;;  %v157_v59 = vadd.f32 1.0, %v155_v57 }
 0x100   :  { %162 = vst [vmem:[%s247_s3 + $0x8] sm:$0xff] %v160_v56  ;;  %v159_v60 = vmul.f32 %v157_v59, %v109_v58 }
 0x102   :  { %161 = vst [vmem:[%s247_s3] sm:$0xff] %v159_v60 }

// kernel: bert_layer_forward.7
= control target key start
LH: loop header
LB: loop body
LE: loop exit
PB: predicated region body
PF: predicated region fallthrough
CT: control target
= control target key end

     0   :  { %vm36_vm0 = vcmask 261120   ;;  %s281_s2 = inlined_call_operand.vmem [shape: f32[32,32], index: 2, kind: input, shape index: {}]   ;;  %s282_s0 = inlined_call_operand.vmem [shape: f32[16,32], index: 0, kind: input, shape index: {}]   ;;  %s283_s3 = inlined_call_operand.vmem [shape: f32[1,32], index: 3, kind: input, shape index: {}]   ;;  %s284_s1 = inlined_call_operand.vmem [shape: f32[16,32], index: 1, kind: input, shape index: {}]   ;;  %s285_s4 = inlined_call_operand.vmem [shape: f32[1,32], index: 4, kind: input, shape index: {}]   ;;  %s286_s5 = inlined_call_operand.vmem [shape: f32[1,32], index: 5, kind: input, shape index: {}]   ;;  %s287_s6 = inlined_call_operand.vmem [shape: f32[16,32], index: 6, kind: output, shape index: {}]  }
   0x1   :  { %v28_v0 = vld [vmem:[%s281_s2 + $0x18] sm:$0xff]  ;;  %v27_v1 = vld [vmem:[%s281_s2 + $0x10] sm:$0xff]  ;;  %v23_v2 = vld [vmem:[%s282_s0] sm:$0xff] }
   0x2   :  { %184 = vmatprep.subr.mxu0 %v28_v0  ;;  %v26_v3 = vld [vmem:[%s281_s2 + $0x8] sm:$0xff]  ;;  %192 = vmatprep.mubr.msk.f32.mxu0 %vm36_vm0, %v23_v2  ;;  %v25_v4 = vld [vmem:[%s281_s2] sm:$0xff] }
   0x3   :  { %185 = vmatpush3.msra.mxu0 %v28_v0  ;;  %v24_v5 = vld [vmem:[%s282_s0 + $0x8] sm:$0xff]  ;;  %v173_v7 = vld [vmem:[%s283_s3] ss:$0 sm:$0xff] }
   0x4   :  { %186 = vmatprep.subr.mxu0 %v27_v1  ;;  %v118_v9 = vld [vmem:[%s284_s1] sm:$0xff]  ;;  %v119_v12 = vld [vmem:[%s284_s1 + $0x8] sm:$0xff] }
   0x5   :  { %187 = vmatpush3.msra.mxu0 %v27_v1  ;;  %v176_v34 = vld [vmem:[%s285_s4] ss:$0 sm:$0xff] }
   0x6   :  { %188 = vmatprep.subr.mxu0 %v26_v3  ;;  %v177_v36 = vld [vmem:[%s286_s5] ss:$0 sm:$0xff] }
   0x7   :  { %189 = vmatpush3.msra.mxu0 %v26_v3 }
   0x8   :  { %190 = vmatprep.subr.mxu0 %v25_v4 }
   0x9   :  { %191 = vmatpush3.msra.mxu0 %v25_v4 }
   0xa   :  { %193 = vmatmul.mubr.msk.f32.vlgmr.msra.gmra.mxu0 %vm36_vm0, %v24_v5 }
  0xca   :  { %v194_v6 = vpop.f32.mrf.mxu0 }
  0xcb   :  { %v115_v10 = vadd.f32 %v194_v6, %v173_v7 }
  0xcc   :  { %v109_v8 = vpop.f32.mrf.mxu0 }
  0xcd   :  { %v110_v11 = vadd.f32 %v173_v7, %v109_v8  ;;  %v121_v15 = vadd.f32 %v119_v12, %v115_v10 }
  0xcf   :  { %v120_v13 = vadd.f32 %v118_v9, %v110_v11  ;;  %v125_v16 = vsel %vm36_vm0, %v121_v15, 0.0 }
  0xd1   :  { %v122_v14 = vsel %vm36_vm0, %v120_v13, 0.0 }
  0xd2   :  { %123 = vadd.xlane.f32.xlu0 %v122_v14 }
  0xd6   :  { %126 = vadd.xlane.f32.xlu0 %v125_v16 }
 0x15b   :  { %v124_v17 = vpop.xlane.xlu0 %123 }
 0x15c   :  { %v129_v18 = vmul.f32 0.03125, %v124_v17 }
 0x15e   :  { %v131_v19 = vsub.f32 %v120_v13, %v129_v18 }
 0x15f   :  { %v127_v20 = vpop.xlane.xlu0 %126 }
 0x160   :  { %v130_v21 = vmul.f32 0.03125, %v127_v20  ;;  %v133_v22 = vmul.f32 %v131_v19, %v131_v19 }
 0x162   :  { %v132_v23 = vsub.f32 %v121_v15, %v130_v21  ;;  %v135_v24 = vsel %vm36_vm0, %v133_v22, 0.0 }
 0x163   :  { %136 = vadd.xlane.f32.xlu1 %v135_v24 }
 0x164   :  { %v134_v25 = vmul.f32 %v132_v23, %v132_v23 }
 0x166   :  { %v138_v26 = vsel %vm36_vm0, %v134_v25, 0.0 }
 0x167   :  { %139 = vadd.xlane.f32.xlu1 %v138_v26 }
 0x1ec   :  { %v137_v27 = vpop.xlane.xlu1 %136 }
 0x1ed   :  { %v141_v28 = vmul.f32 0.03125, %v137_v27 }
 0x1ef   :  { %v143_v29 = vadd.f32 1e-12, %v141_v28 }
 0x1f0   :  { %v140_v30 = vpop.xlane.xlu1 %139 }
 0x1f1   :  { %195 = vrsqrt.f32 %v143_v29  ;;  %v142_v31 = vmul.f32 0.03125, %v140_v30 }
 0x1f3   :  { %v144_v32 = vadd.f32 1e-12, %v142_v31 }
 0x1f5   :  { %197 = vrsqrt.f32 %v144_v32 }
 0x1fe   :  { %v196_v33 = vpop.eup %195 }
 0x1ff   :  { %v147_v35 = vmul.f32 %v196_v33, %v131_v19 }
 0x201   :  { %v156_v37 = vmul.f32 %v176_v34, %v147_v35 }
 0x202   :  { %v198_v38 = vpop.eup %197 }
 0x203   :  { %v165_v39 = vadd.f32 %v177_v36, %v156_v37  ;;  %v148_v40 = vmul.f32 %v198_v38, %v132_v23 }
 0x205   :  { %167 = vst.msk [vmem:[%s287_s6] sm:$0xff] %vm36_vm0, %v165_v39  ;;  %v157_v41 = vmul.f32 %v176_v34, %v148_v40 }
 0x207   :  { %v166_v42 = vadd.f32 %v177_v36, %v157_v41 }
 0x209   :  { %168 = vst.msk [vmem:[%s287_s6 + $0x8] sm:$0xff] %vm36_vm0, %v166_v42 }

// kernel: bert_layer_forward.6
= control target key start
LH: loop header
LB: loop body
LE: loop exit
PB: predicated region body
PF: predicated region fallthrough
CT: control target
= control target key end

     0   :  { %s1279_s15 = smov 0   ;;  %s1281_s16 = smov 0   ;;  %s1388_s0 = inlined_call_operand.vmem [shape: f32[2,8,32], index: 0, kind: input, shape index: {}]   ;;  %s1389_s1 = inlined_call_operand.vmem [shape: f32[2,8,32], index: 1, kind: input, shape index: {}]   ;;  %s1390_s2 = inlined_call_operand.vmem [shape: f32[2,8,32], index: 2, kind: input, shape index: {}]   ;;  %s1391_s3 = inlined_call_operand.vmem [shape: f32[2,1,8], index: 3, kind: input, shape index: {}]   ;;  %s1392_s4 = inlined_call_operand.vmem [shape: f32[2,8,32], index: 4, kind: output, shape index: {}]  }
   0x1   :  { %s1283_s17 = smov 0  }
   0x2 LB: > { %s26_s18 = sadd.s32 1, %s1240_s16  ;;  %p1098_p0 = scmp.ge.s32.totalorder %s1244_s17, 1  ;;  %s1244_s17 = sphi %s1283_s17, %s14_s17   ;;  %s1240_s16 = sphi %s1281_s16, %s1394_s16   ;;  %s1236_s15 = sphi %s1279_s15, %s1393_s15  }
   0x3   : > { %p28_p1 = scmp.ge.s32.totalorder %s26_s18, 2  ;;  %p216_p2 = scmp.lt.s32.totalorder %s1244_s17, 3 }
   0x5   : > { %s1396_s18 = smov (%p28_p1, %s26_s18), 0  ;;  %p217_p3 = pnand %p1098_p0, %p216_p2 }
   0x6   : > { %p263_p4 = scmp.lt.s32.totalorder (!%p217_p3), %s1236_s15, 1  ;;  %s1248_s26 = smov (!%p217_p3), 120  }
   0x7   : > { %220 = sbr.rel (%p217_p3) target bundleno = 1092 (0x444), region = 36  ;;  %s1249_s27 = smov (!%p217_p3), 112  }
   0x8   : > { %s1250_s28 = smov (!%p217_p3), 104   ;;  %s1251_s9 = smov (!%p217_p3), 8  }
   0x9   : > { %s1252_s10 = smov (!%p217_p3), 16   ;;  %s1253_s11 = smov (!%p217_p3), 24  }
   0xc   : > { %v1246_v0 = vmov 0.0   ;;  %vm1247_vm0 = vmmov 0   ;;  %s1398_s15 = smov (!%p263_p4, %s1236_s15), 1  ;;  %vm305_vm1 = vcmask 64512   ;;  %vm975_vm2 = vcmask 130048  }
   0xd   : > { %1134 = vmatprep.subr.mxu0 %v1246_v0  ;;  %1136 = vmatprep.mubr.msk.f32.mxu0 %vm1247_vm0, %v1246_v0  ;;  %s1303_s19 = sshll.u32 %s1398_s15, 3  ;;  %s286_s5 = scalar_lea.vmem %s1391_s3, %s1398_s15  ;;  %vm977_vm3 = vcmask 195584   ;;  %vm979_vm4 = vcmask 261120  }
   0xe   : > { %1139 = vmatprep.subr.mxu1 %v1246_v0  ;;  %1141 = vmatprep.mubr.msk.f32.mxu1 %vm1247_vm0, %v1246_v0  ;;  %s276_s22 = scalar_lea.vmem %s1389_s1, %s1303_s19  ;;  %s269_s25 = scalar_lea.vmem %s1388_s0, %s1303_s19  ;;  %v1103_v4 = vld [vmem:[%s286_s5] ss:$0 sm:$0xff] }
   0xf   : > { %v296_v1 = vld [vmem:[%s276_s22] sm:$0xff]  ;;  %s283_s8 = scalar_lea.vmem %s1390_s2, %s1303_s19  ;;  %s293_s14 = scalar_lea.vmem %s1392_s4, %s1303_s19 }
  0x10   : > { %v295_v2 = vld [vmem:[%s269_s25] sm:$0xff]  ;;  %1135 = vmatpush3.xpose.msk.msra.mxu0 %vm305_vm1, %v296_v1 }
  0x11   : > { %v298_v3 = vmul.f32 0.35355338, %v295_v2  ;;  %1149 = vmatprep.subr.mxu0 %v1246_v0  ;;  %v297_v9 = vld [vmem:[%s283_s8] sm:$0xff] }
  0x12   : > { %1140 = vmatpush3.msra.mxu1 %v297_v9 }
  0x13   : > { %1137 = vmatmul.mubr.msk.f32.vlgmr.msra.gmra.mxu0 %vm305_vm1, %v298_v3  ;;  %466 = vrot.lane.b32.xlu1 %v298_v3, %s1248_s26 }
  0x14   : > { %1151 = vmatprep.mubr.msk.f32.mxu0 %vm1247_vm0, %v1246_v0  ;;  %1144 = vmatprep.subr.mxu1 %v1246_v0 }
  0x17   : > { %634 = vrot.lane.b32.xlu1 %v296_v1, %s1249_s27 }
  0x1b   : > { %632 = vrot.lane.b32.xlu1 %v298_v3, %s1249_s27 }
  0x1f   : > { %799 = vrot.lane.b32.xlu1 %v296_v1, %s1250_s28 }
  0x23   : > { %797 = vrot.lane.b32.xlu1 %v298_v3, %s1250_s28 }
  0x85   : > { %v467_v13 = vpop.permute.xlu1 %466 }
  0x89   : > { %v635_v14 = vpop.permute.xlu1 %634 }
  0x8d   : > { %v633_v17 = vpop.permute.xlu1 %632 }
  0x91   : > { %v800_v18 = vpop.permute.xlu1 %799 }
  0x95   : > { %v798_v19 = vpop.permute.xlu1 %797 }
  0xd3   : > { %v378_v5 = vpop.f32.mrf.mxu0 }
  0xd4   : > { %v379_v6 = vadd.f32 %v1103_v4, %v378_v5 }
  0xd5   : > { %v1138_v7 = vpop.f32.mrf.mxu0 }
  0xd6   : > { %v382_v8 = vsel %vm305_vm1, %v379_v6, -inf }
  0xd7   : > { %383 = vmax.xlane.f32.xlu0 %v382_v8 }
  0xed   : > { %468 = vrot.lane.b32.xlu0 %v296_v1, %s1248_s26 }
 0x160   : > { %v384_v10 = vpop.xlane.xlu0 %383 }
 0x161   : > { %v385_v11 = vsub.f32 %v379_v6, %v384_v10 }
 0x163   : > { %v386_v12 = vmul.f32 1.442695, %v385_v11 }
 0x164   : > { %v469_v15 = vpop.permute.xlu0 %468 }
 0x165   : > { %1206 = vpow2.f32 %v386_v12 }
 0x172   : > { %v1333_v16 = vpop.eup %1206 }
 0x173   : > { %1142 = vmatmul.mubr.msk.f32.vlgmr.msra.gmra.mxu1 %vm305_vm1, %v1333_v16  ;;  %v388_v52 = vsel %vm305_vm1, %v1333_v16, 0.0 }
 0x174   : > { %1145 = vmatpush3.xpose.msk.msra.mxu1 %vm305_vm1, %v469_v15  ;;  %1146 = vmatprep.mubr.msk.f32.mxu1 %vm1247_vm0, %v1246_v0 }
 0x175   : > { %1154 = vmatprep.subr.mxu1 %v1246_v0 }
 0x177   : > { %1147 = vmatmul.mubr.msk.f32.vlgmr.msra.gmra.mxu1 %vm305_vm1, %v467_v13 }
 0x178   : > { %1155 = vmatpush3.xpose.msk.msra.mxu1 %vm305_vm1, %v635_v14  ;;  %1156 = vmatprep.mubr.msk.f32.mxu1 %vm1247_vm0, %v1246_v0 }
 0x179   : > { %1164 = vmatprep.subr.mxu1 %v1246_v0 }
 0x17b   : > { %1157 = vmatmul.mubr.msk.f32.vlgmr.msra.gmra.mxu1 %vm305_vm1, %v633_v17 }
 0x17c   : > { %1165 = vmatpush3.xpose.msk.msra.mxu1 %vm305_vm1, %v800_v18  ;;  %1166 = vmatprep.mubr.msk.f32.mxu1 %vm1247_vm0, %v1246_v0 }
 0x17f   : > { %1167 = vmatmul.mubr.msk.f32.vlgmr.msra.gmra.mxu1 %vm305_vm1, %v798_v19 }
 0x233   : > { %v1351_v20 = vpop.f32.mrf.mxu1 }
 0x235   : > { %v1143_v21 = vpop.f32.mrf.mxu1 }
 0x237   : > { %v540_v22 = vpop.f32.mrf.mxu1 }
 0x238   : > { %v541_v23 = vadd.f32 %v1103_v4, %v540_v22 }
 0x239   : > { %v1148_v24 = vpop.f32.mrf.mxu1 }
 0x23a   : > { %v544_v25 = vsel %vm305_vm1, %v541_v23, -inf }
 0x23b   : > { %545 = vmax.xlane.f32.xlu1 %v544_v25  ;;  %v706_v26 = vpop.f32.mrf.mxu1 }
 0x23c   : > { %v707_v27 = vadd.f32 %v1103_v4, %v706_v26 }
 0x23d   : > { %v1158_v28 = vpop.f32.mrf.mxu1 }
 0x23e   : > { %v710_v29 = vsel %vm305_vm1, %v707_v27, -inf }
 0x23f   : > { %711 = vmax.xlane.f32.xlu0 %v710_v29  ;;  %v871_v30 = vpop.f32.mrf.mxu1 }
 0x240   : > { %v872_v32 = vadd.f32 %v1103_v4, %v871_v30 }
 0x241   : > { %v1168_v31 = vpop.f32.mrf.mxu1 }
 0x242   : > { %v875_v33 = vsel %vm305_vm1, %v872_v32, -inf }
 0x24c   : > { %719 = vrot.lane.b32.xlu1 %v297_v9, %s1249_s27 }
 0x255   : > { %554 = vrot.lane.b32.xlu0 %v297_v9, %s1248_s26 }
 0x270   : > { %876 = vmax.xlane.f32.xlu1 %v875_v33 }
 0x281   : > { %884 = vrot.lane.b32.xlu1 %v297_v9, %s1250_s28 }
 0x2c4   : > { %v546_v34 = vpop.xlane.xlu1 %545 }
 0x2c5   : > { %v547_v35 = vsub.f32 %v541_v23, %v546_v34 }
 0x2c7   : > { %v548_v36 = vmul.f32 1.442695, %v547_v35 }
 0x2c8   : > { %v712_v37 = vpop.xlane.xlu0 %711  ;;  %v720_v42 = vpop.permute.xlu1 %719 }
 0x2c9   : > { %1208 = vpow2.f32 %v548_v36  ;;  %v713_v38 = vsub.f32 %v707_v27, %v712_v37 }
 0x2cb   : > { %v714_v39 = vmul.f32 1.442695, %v713_v38 }
 0x2cc   : > { %v555_v40 = vpop.permute.xlu0 %554 }
 0x2cd   : > { %1210 = vpow2.f32 %v714_v39  ;;  %1150 = vmatpush3.msra.mxu0 %v555_v40 }
 0x2ce   : > { %1159 = vmatprep.subr.mxu0 %v1246_v0 }
 0x2d6   : > { %v1209_v41 = vpop.eup %1208 }
 0x2d7   : > { %1152 = vmatmul.mubr.msk.f32.vlgmr.msra.gmra.mxu0 %vm305_vm1, %v1209_v41  ;;  %v550_v43 = vsel %vm305_vm1, %v1209_v41, 0.0 }
 0x2d8   : > { %1160 = vmatpush3.msra.mxu0 %v720_v42  ;;  %551 = vadd.xlane.f32.xlu0 %v550_v43 }
 0x2d9   : > { %1161 = vmatprep.mubr.msk.f32.mxu0 %vm1247_vm0, %v1246_v0  ;;  %1169 = vmatprep.subr.mxu0 %v1246_v0 }
 0x2da   : > { %v1211_v44 = vpop.eup %1210 }
 0x2db   : > { %1162 = vmatmul.mubr.msk.f32.vlgmr.msra.gmra.mxu0 %vm305_vm1, %v1211_v44  ;;  %v716_v45 = vsel %vm305_vm1, %v1211_v44, 0.0 }
 0x2dc   : > { %717 = vadd.xlane.f32.xlu1 %v716_v45  ;;  %1171 = vmatprep.mubr.msk.f32.mxu0 %vm1247_vm0, %v1246_v0 }
 0x2f9   : > { %v877_v46 = vpop.xlane.xlu1 %876 }
 0x2fa   : > { %v878_v47 = vsub.f32 %v872_v32, %v877_v46 }
 0x2fc   : > { %v879_v48 = vmul.f32 1.442695, %v878_v47 }
 0x2fd   : > { %v885_v49 = vpop.permute.xlu1 %884 }
 0x2fe   : > { %1212 = vpow2.f32 %v879_v48  ;;  %1170 = vmatpush3.msra.mxu0 %v885_v49 }
 0x30b   : > { %v1213_v50 = vpop.eup %1212 }
 0x30c   : > { %1172 = vmatmul.mubr.msk.f32.vlgmr.msra.gmra.mxu0 %vm305_vm1, %v1213_v50  ;;  %v881_v51 = vsel %vm305_vm1, %v1213_v50, 0.0 }
 0x30d   : > { %882 = vadd.xlane.f32.xlu0 %v881_v51 }
 0x311   : > { %389 = vadd.xlane.f32.xlu0 %v388_v52 }
 0x361   : > { %v552_v53 = vpop.xlane.xlu0 %551 }
 0x362   : > { %1214 = vrcp.f32 %v552_v53 }
 0x365   : > { %v718_v54 = vpop.xlane.xlu1 %717 }
 0x366   : > { %1216 = vrcp.f32 %v718_v54 }
 0x36f   : > { %v1215_v55 = vpop.eup %1214 }
 0x373   : > { %v1217_v59 = vpop.eup %1216 }
 0x396   : > { %v883_v63 = vpop.xlane.xlu0 %882 }
 0x397   : > { %v626_v56 = vpop.f32.mrf.mxu0  ;;  %1218 = vrcp.f32 %v883_v63 }
 0x398   : > { %v631_v57 = vmul.f32 %v1215_v55, %v626_v56 }
 0x399   : > { %v1153_v58 = vpop.f32.mrf.mxu0 }
 0x39a   : > { %963 = vrot.lane.b32.xlu1 %v631_v57, %s1251_s9  ;;  %v390_v4 = vpop.xlane.xlu0 %389 }
 0x39b   : > { %v791_v60 = vpop.f32.mrf.mxu0  ;;  %1220 = vrcp.f32 %v390_v4 }
 0x39c   : > { %v796_v61 = vmul.f32 %v1217_v59, %v791_v60 }
 0x39d   : > { %v1163_v62 = vpop.f32.mrf.mxu0 }
 0x39e   : > { %967 = vrot.lane.b32.xlu0 %v796_v61, %s1252_s10 }
 0x3a4   : > { %v1219_v0 = vpop.eup %1218 }
 0x3a8   : > { %v1221_v5 = vpop.eup %1220 }
 0x3a9   : > { %v465_v7 = vmul.f32 %v1221_v5, %v1351_v20 }
 0x3cc   : > { %v956_v1 = vpop.f32.mrf.mxu0 }
 0x3cd   : > { %v961_v2 = vmul.f32 %v1219_v0, %v956_v1 }
 0x3ce   : > { %v1173_v3 = vpop.f32.mrf.mxu0 }
 0x3cf   : > { %971 = vrot.lane.b32.xlu1 %v961_v2, %s1253_s11 }
 0x40c   : > { %v964_v6 = vpop.permute.xlu1 %963 }
 0x40d   : > { %v974_v9 = vsel %vm305_vm1, %v465_v7, %v964_v6 }
 0x410   : > { %v968_v8 = vpop.permute.xlu0 %967 }
 0x411   : > { %v976_v10 = vsel %vm975_vm2, %v974_v9, %v968_v8 }
 0x441   : > { %v972_v11 = vpop.permute.xlu1 %971 }
 0x442   : > { %v978_v12 = vsel %vm977_vm3, %v976_v10, %v972_v11 }
 0x443   : > { %980 = vst.msk [vmem:[%s293_s14] sm:$0xff] %vm979_vm4, %v978_v12 }
 0x444 PF: > { %s14_s17 = sadd.s32 1, %s1244_s17   ;;  %s1393_s15 = smov %s1240_s16 }
 0x445   : > { %p11_p5 = scmp.ge.s32.totalorder %s14_s17, 4   ;;  %s1394_s16 = smov %s1396_s18 }
 0x447   :  { %13 = sbr.rel (!%p11_p5) target bundleno = 2 (0x2), region = 75 }

// kernel: bert_layer_forward.9
= control target key start
LH: loop header
LB: loop body
LE: loop exit
PB: predicated region body
PF: predicated region fallthrough
CT: control target
= control target key end

     0   :  { %s393_s0 = inlined_call_operand.vmem [shape: f32[16,128], index: 0, kind: input, shape index: {}]   ;;  %s394_s1 = inlined_call_operand.vmem [shape: f32[16,32], index: 1, kind: input, shape index: {}]   ;;  %s395_s2 = inlined_call_operand.vmem [shape: f32[128,32], index: 2, kind: input, shape index: {}]   ;;  %s396_s3 = inlined_call_operand.vmem [shape: f32[1,32], index: 3, kind: input, shape index: {}]   ;;  %s397_s4 = inlined_call_operand.vmem [shape: f32[1,32], index: 4, kind: input, shape index: {}]   ;;  %s398_s5 = inlined_call_operand.vmem [shape: f32[1,32], index: 5, kind: input, shape index: {}]   ;;  %s399_s6 = inlined_call_operand.hbm [shape: f32[16,32], index: 6, kind: output, shape index: {}]  }
   0x1   :  { %v41_v0 = vld [vmem:[%s395_s2 + $0x78] sm:$0xff]  ;;  %v40_v1 = vld [vmem:[%s395_s2 + $0x70] sm:$0xff]  ;;  %v39_v2 = vld [vmem:[%s395_s2 + $0x68] sm:$0xff] }
   0x2   :  { %213 = vmatprep.subr.mxu0 %v41_v0  ;;  %v38_v3 = vld [vmem:[%s395_s2 + $0x60] sm:$0xff]  ;;  %v37_v5 = vld [vmem:[%s395_s2 + $0x58] sm:$0xff] }
   0x3   :  { %214 = vmatpush3.msra.mxu0 %v41_v0  ;;  %v24_v4 = vld [vmem:[%s393_s0] sm:$0xff] }
   0x4   :  { %215 = vmatprep.subr.mxu0 %v40_v1  ;;  %245 = vmatprep.mubr.f32.mxu0 %v24_v4 }
   0x5   :  { %216 = vmatpush3.msra.mxu0 %v40_v1 }
   0x6   :  { %217 = vmatprep.subr.mxu0 %v39_v2 }
   0x7   :  { %218 = vmatpush3.msra.mxu0 %v39_v2 }
   0x8   :  { %11 = vsyncpa [#allocation3], 0  ;;  %219 = vmatprep.subr.mxu0 %v38_v3  ;;  %v36_v6 = vld [vmem:[%s395_s2 + $0x50] sm:$0xff]  ;;  %v35_v7 = vld [vmem:[%s395_s2 + $0x48] sm:$0xff]  ;;  %vm128_vm0 = vcmask 261120   ;;  %s277_s15 = smov [#allocation2]  }
   0x9   :  { %220 = vmatpush3.msra.mxu0 %v38_v3  ;;  %v34_v8 = vld [vmem:[%s395_s2 + $0x40] sm:$0xff]  ;;  %v33_v9 = vld [vmem:[%s395_s2 + $0x38] sm:$0xff]  ;;  %v32_v10 = vld [vmem:[%s395_s2 + $0x30] sm:$0xff]  ;;  %s181_s16 = sshll.u32 %s277_s15, 4  ;;  %s182_s16 = int_to_ptr.vmem [resolvable:$true] %s181_s16 }
   0xa   :  { %221 = vmatprep.subr.mxu0 %v37_v5  ;;  %v31_v11 = vld [vmem:[%s395_s2 + $0x28] sm:$0xff]  ;;  %v30_v12 = vld [vmem:[%s395_s2 + $0x20] sm:$0xff]  ;;  %v29_v13 = vld [vmem:[%s395_s2 + $0x18] sm:$0xff]  ;;  %s255_s17 = scalar_lea.vmem %s182_s16, 256  ;;  %p260_p1 = scmp.lt.s32.totalorder %s182_s16, %s182_s16 }
   0xb   :  { %222 = vmatpush3.msra.mxu0 %v37_v5  ;;  %v28_v14 = vld [vmem:[%s395_s2 + $0x10] sm:$0xff]  ;;  %v27_v15 = vld [vmem:[%s395_s2 + $0x8] sm:$0xff]  ;;  %v26_v16 = vld [vmem:[%s395_s2] sm:$0xff]  ;;  %p256_p0 = scmp.ne.s32.totalorder %s182_s16, %s255_s17  ;;  %p261_p2 = scmp.lt.s32.totalorder %s255_s17, %s255_s17 }
   0xc   :  { %223 = vmatprep.subr.mxu0 %v36_v6  ;;  %v25_v17 = vld [vmem:[%s393_s0 + $0x8] sm:$0xff]  ;;  %v192_v19 = vld [vmem:[%s396_s3] ss:$0 sm:$0xff] }
   0xd   :  { %224 = vmatpush3.msra.mxu0 %v36_v6  ;;  %v124_v21 = vld [vmem:[%s394_s1] sm:$0xff]  ;;  %v125_v24 = vld [vmem:[%s394_s1 + $0x8] sm:$0xff]  ;;  %p262_p3 = por %p261_p2, %p260_p1 }
   0xe   :  { %225 = vmatprep.subr.mxu0 %v35_v7  ;;  %v193_v46 = vld [vmem:[%s397_s4] ss:$0 sm:$0xff] }
   0xf   :  { %226 = vmatpush3.msra.mxu0 %v35_v7  ;;  %v194_v48 = vld [vmem:[%s398_s5] ss:$0 sm:$0xff]  ;;  %p263_p4 = pnand %p262_p3, %p256_p0 }
  0x10   :  { %227 = vmatprep.subr.mxu0 %v34_v8 }
  0x11   :  { %228 = vmatpush3.msra.mxu0 %v34_v8 }
  0x12   :  { %229 = vmatprep.subr.mxu0 %v33_v9 }
  0x13   :  { %230 = vmatpush3.msra.mxu0 %v33_v9 }
  0x14   :  { %231 = vmatprep.subr.mxu0 %v32_v10 }
  0x15   :  { %232 = vmatpush3.msra.mxu0 %v32_v10 }
  0x16   :  { %233 = vmatprep.subr.mxu0 %v31_v11 }
  0x17   :  { %234 = vmatpush3.msra.mxu0 %v31_v11 }
  0x18   :  { %235 = vmatprep.subr.mxu0 %v30_v12 }
  0x19   :  { %236 = vmatpush3.msra.mxu0 %v30_v12 }
  0x1a   :  { %237 = vmatprep.subr.mxu0 %v29_v13 }
  0x1b   :  { %238 = vmatpush3.msra.mxu0 %v29_v13 }
  0x1c   :  { %239 = vmatprep.subr.mxu0 %v28_v14 }
  0x1d   :  { %240 = vmatpush3.msra.mxu0 %v28_v14 }
  0x1e   :  { %241 = vmatprep.subr.mxu0 %v27_v15 }
  0x1f   :  { %242 = vmatpush3.msra.mxu0 %v27_v15 }
  0x20   :  { %243 = vmatprep.subr.mxu0 %v26_v16 }
  0x21   :  { %244 = vmatpush3.msra.mxu0 %v26_v16 }
  0x22   :  { %246 = vmatmul.mubr.f32.vlgmr.msra.gmra.mxu0 %v25_v17 }
  0xe2   :  { %v247_v18 = vpop.f32.mrf.mxu0 }
  0xe3   :  { %v121_v22 = vadd.f32 %v247_v18, %v192_v19 }
  0xe4   :  { %v115_v20 = vpop.f32.mrf.mxu0 }
  0xe5   :  { %v116_v23 = vadd.f32 %v192_v19, %v115_v20  ;;  %v127_v27 = vadd.f32 %v125_v24, %v121_v22 }
  0xe7   :  { %v126_v25 = vadd.f32 %v124_v21, %v116_v23  ;;  %v132_v28 = vsel %vm128_vm0, %v127_v27, 0.0 }
  0xe9   :  { %v129_v26 = vsel %vm128_vm0, %v126_v25, 0.0 }
  0xea   :  { %130 = vadd.xlane.f32.xlu0 %v129_v26 }
  0xee   :  { %133 = vadd.xlane.f32.xlu0 %v132_v28 }
 0x173   :  { %v131_v29 = vpop.xlane.xlu0 %130 }
 0x174   :  { %v136_v30 = vmul.f32 0.03125, %v131_v29 }
 0x176   :  { %v138_v31 = vsub.f32 %v126_v25, %v136_v30 }
 0x177   :  { %v134_v32 = vpop.xlane.xlu0 %133 }
 0x178   :  { %v137_v33 = vmul.f32 0.03125, %v134_v32  ;;  %v140_v34 = vmul.f32 %v138_v31, %v138_v31 }
 0x17a   :  { %v139_v35 = vsub.f32 %v127_v27, %v137_v33  ;;  %v142_v36 = vsel %vm128_vm0, %v140_v34, 0.0 }
 0x17b   :  { %143 = vadd.xlane.f32.xlu1 %v142_v36 }
 0x17c   :  { %v141_v37 = vmul.f32 %v139_v35, %v139_v35 }
 0x17e   :  { %v145_v38 = vsel %vm128_vm0, %v141_v37, 0.0 }
 0x17f   :  { %146 = vadd.xlane.f32.xlu1 %v145_v38 }
 0x204   :  { %v144_v39 = vpop.xlane.xlu1 %143 }
 0x205   :  { %v148_v40 = vmul.f32 0.03125, %v144_v39 }
 0x207   :  { %v150_v41 = vadd.f32 1e-12, %v148_v40 }
 0x208   :  { %v147_v42 = vpop.xlane.xlu1 %146 }
 0x209   :  { %251 = vrsqrt.f32 %v150_v41  ;;  %v149_v43 = vmul.f32 0.03125, %v147_v42 }
 0x20b   :  { %v151_v44 = vadd.f32 1e-12, %v149_v43 }
 0x20d   :  { %253 = vrsqrt.f32 %v151_v44 }
 0x216   :  { %v252_v45 = vpop.eup %251 }
 0x217   :  { %v154_v47 = vmul.f32 %v252_v45, %v138_v31 }
 0x219   :  { %v163_v49 = vmul.f32 %v193_v46, %v154_v47 }
 0x21a   :  { %v254_v50 = vpop.eup %253 }
 0x21b   :  { %v155_v51 = vmul.f32 %v254_v50, %v139_v35  ;;  %v172_v52 = vadd.f32 %v194_v48, %v163_v49 }
 0x21d   :  { %v164_v53 = vmul.f32 %v193_v46, %v155_v51  ;;  %174 = vst.msk [vmem:[#allocation2] sm:$0xff] %vm128_vm0, %v172_v52 }
 0x21f   :  { %v173_v54 = vadd.f32 %v194_v48, %v164_v53 }
 0x221   :  { %175 = vst.msk [vmem:[#allocation2 + $0x8] sm:$0xff] %vm128_vm0, %v173_v54 }
 0x222   :  { %266 = shalt.err (!%p263_p4)
}
 0x223   :  { %s278_s4 = smov 128   ;;  %s279_s5 = smov 8  }
 0x224   :  { %187 = dma.vmem_to_hbm [thread:$0]  %s182_s16, 256, %s399_s6, [#allocation3], %s278_s4, %s278_s4, %s279_s5  }
 0x225   :  { %275 = dma.done.wait [#allocation3], 256  }
 0x226   :  { %276 = vsyncadd [#allocation3], 4294967040 }
 0x227   :  { %191 = vsyncpa [#allocation3], 1 }

</bundles_post_ra>
